<compile_context>
chip_gen: v6e
topology: v6e:2x2x1
jax: 0.10.0
libtpu: 0.0.40
codegen_flags: <defaults>
</compile_context>

<pallas_src>
import math

import jax
import jax.numpy as jnp
from jax.experimental import pallas as pl
from jax.experimental.pallas import tpu as pltpu  # noqa: F401  (TPU backend)

# ----------------------- tiny synthetic BERT config -----------------------
B, S, H = 2, 8, 32            # batch, seq len, hidden
NUM_HEADS = 4
HEAD_DIM = H // NUM_HEADS
INTER = 4 * H                 # FFN intermediate size
NUM_LAYERS = 2
VOCAB, MAX_POS, TYPE_VOCAB = 100, S, 2
LN_EPS = 1e-12

LAYER_PARAM_ORDER = (
    "wqkv", "bqkv", "wo", "bo", "ln1_g", "ln1_b",
    "wi", "bi", "wf", "bf", "ln2_g", "ln2_b",
)
PER_LAYER = len(LAYER_PARAM_ORDER)


# ------------------------------ kernel helpers -----------------------------
def _layernorm(x, g, b):
    mu = jnp.mean(x, axis=-1, keepdims=True)
    var = jnp.mean((x - mu) ** 2, axis=-1, keepdims=True)
    return (x - mu) * jax.lax.rsqrt(var + LN_EPS) * g + b


def _gelu(x):
    # tanh approximation of GELU (BERT "gelu_new"); exact-erf GELU differs
    # only at ~1e-3 level for these magnitudes.
    return 0.5 * x * (1.0 + jnp.tanh(0.7978845608028654 * (x + 0.044715 * x * x * x)))


def _encoder_layer(x, wqkv, bqkv, wo, bo, g1, b1, wi, bi, wf, bf, g2, b2):
    """One BERT encoder layer.  x: (B*S, H) f32 -> (B*S, H) f32."""
    # Fused QKV projection: single (B*S, H) @ (H, 3H) matmul.
    qkv = jnp.dot(x, wqkv, preferred_element_type=jnp.float32) + bqkv    # (B*S, 3H)
    q = qkv[:, 0 * H:1 * H].reshape(B, S, H)
    k = qkv[:, 1 * H:2 * H].reshape(B, S, H)
    v = qkv[:, 2 * H:3 * H].reshape(B, S, H)

    scale = 1.0 / math.sqrt(HEAD_DIM)
    ctx_heads = []
    for h in range(NUM_HEADS):              # static unroll over heads
        lo = h * HEAD_DIM
        qh = q[:, :, lo:lo + HEAD_DIM]
        kh = k[:, :, lo:lo + HEAD_DIM]
        vh = v[:, :, lo:lo + HEAD_DIM]
        # Batched over B in one contraction (no explicit transposes).
        s = jnp.einsum("bqd,bkd->bqk", qh, kh,
                       preferred_element_type=jnp.float32) * scale       # (B, S, S)
        s = s - jnp.max(s, axis=-1, keepdims=True)
        p = jnp.exp(s)
        p = p * pl.reciprocal(jnp.sum(p, axis=-1, keepdims=True), approx=True)
        ctx_heads.append(jnp.einsum("bqk,bkd->bqd", p, vh,
                                    preferred_element_type=jnp.float32))
    ctx = jnp.concatenate(ctx_heads, axis=-1).reshape(B * S, H)          # (B*S, H)

    attn_out = jnp.dot(ctx, wo, preferred_element_type=jnp.float32) + bo
    h1 = _layernorm(x + attn_out, g1, b1)

    inter = _gelu(jnp.dot(h1, wi, preferred_element_type=jnp.float32) + bi)
    ffn = jnp.dot(inter, wf, preferred_element_type=jnp.float32) + bf
    return _layernorm(h1 + ffn, g2, b2)


# --------------------- fully fused BertMidLayer kernel ---------------------
def fused_bert_kernel(*refs):
    # refs = (emb, emb_ln_g, emb_ln_b, <layer0 params...>, <layer1 params...>, out)
    emb_ref, eg_ref, eb_ref = refs[0], refs[1], refs[2]
    out_ref = refs[-1]
    layer_refs = refs[3:-1]

    hidden0 = _layernorm(emb_ref[...], eg_ref[...], eb_ref[...])         # (B*S, H)

    hiddens = [hidden0]
    for l in range(NUM_LAYERS):
        p = [r[...] for r in layer_refs[l * PER_LAYER:(l + 1) * PER_LAYER]]
        hiddens.append(_encoder_layer(hiddens[-1], *p))

    # BertMidLayer.forward: torch.add(hidden_states[-2], hidden_states[-1])
    out_ref[...] = (hiddens[-2] + hiddens[-1]).astype(out_ref.dtype)


# ----------------------------- parameter setup -----------------------------
def init_params(key):
    keys = iter(jax.random.split(key, 3 + NUM_LAYERS * 8))

    def nrm(shape, scale=0.05):
        return (scale * jax.random.normal(next(keys), shape)).astype(jnp.float32)

    params = {
        "word_emb": nrm((VOCAB, H)),
        "pos_emb": nrm((MAX_POS, H)),
        "type_emb": nrm((TYPE_VOCAB, H)),
        "emb_ln_g": jnp.ones((1, H), jnp.float32),
        "emb_ln_b": jnp.zeros((1, H), jnp.float32),
        "layers": [],
    }
    for _ in range(NUM_LAYERS):
        lp = {
            "wqkv": nrm((H, 3 * H)), "bqkv": nrm((1, 3 * H), 0.01),
            "wo": nrm((H, H)), "bo": nrm((1, H), 0.01),
            "ln1_g": jnp.ones((1, H), jnp.float32),
            "ln1_b": jnp.zeros((1, H), jnp.float32),
            "wi": nrm((H, INTER)), "bi": nrm((1, INTER), 0.01),
            "wf": nrm((INTER, H)), "bf": nrm((1, H), 0.01),
            "ln2_g": jnp.ones((1, H), jnp.float32),
            "ln2_b": jnp.zeros((1, H), jnp.float32),
        }
        params["layers"].append(lp)
    return params


# ------------------------------ model forward -------------------------------
@jax.jit
def bert_mid_layer_forward(token_ids, params):
    # Embedding gather is plain-JAX glue (data-dependent gather); everything
    # downstream runs in one fused Pallas kernel.
    pos_ids = jnp.arange(S)
    emb = (params["word_emb"][token_ids]
           + params["pos_emb"][pos_ids][None, :, :]
           + params["type_emb"][0][None, None, :])                       # (B, S, H)
    emb2d = emb.reshape(B * S, H).astype(jnp.float32)                    # batch -> sublanes

    flat_inputs = [emb2d, params["emb_ln_g"], params["emb_ln_b"]]
    for lp in params["layers"]:
        flat_inputs += [lp[name] for name in LAYER_PARAM_ORDER]

    # No grid, no BlockSpecs: every operand (activation + <100 KB of weights)
    # is brought fully into VMEM for a single kernel invocation.
    out2d = pl.pallas_call(
        fused_bert_kernel,
        out_shape=jax.ShapeDtypeStruct((B * S, H), jnp.float32),
    )(*flat_inputs)
    return out2d.reshape(B, S, H)


# ----------------------------------- main -----------------------------------
if __name__ == "__main__":
    key = jax.random.PRNGKey(0)
    key_params, key_ids = jax.random.split(key)
    params = init_params(key_params)

    # x: token ids, (B, S) int32 — matches BertMidLayer's input.
    x = jax.random.randint(key_ids, (B, S), 0, VOCAB, dtype=jnp.int32)

    out = bert_mid_layer_forward(x, params)
    out = jax.block_until_ready(out)
    assert out.shape == (B, S, H) and out.dtype == jnp.float32

    # TODO(synk): pretrained-checkpoint loading (BertModel.from_pretrained) is
    # replaced by deterministic synthetic parameters; attention_mask /
    # token_type_ids are assumed all-ones / all-zeros.
    print("KERNEL_OK")
</pallas_src>

<mosaic_0001>
module attributes {stable_mosaic.version = 11 : i64} {
  func.func @fused_bert_kernel(%arg0: memref<16x32xf32, #tpu.memory_space<vmem>>, %arg1: memref<1x32xf32, #tpu.memory_space<vmem>>, %arg2: memref<1x32xf32, #tpu.memory_space<vmem>>, %arg3: memref<32x96xf32, #tpu.memory_space<vmem>>, %arg4: memref<1x96xf32, #tpu.memory_space<vmem>>, %arg5: memref<32x32xf32, #tpu.memory_space<vmem>>, %arg6: memref<1x32xf32, #tpu.memory_space<vmem>>, %arg7: memref<1x32xf32, #tpu.memory_space<vmem>>, %arg8: memref<1x32xf32, #tpu.memory_space<vmem>>, %arg9: memref<32x128xf32, #tpu.memory_space<vmem>>, %arg10: memref<1x128xf32, #tpu.memory_space<vmem>>, %arg11: memref<128x32xf32, #tpu.memory_space<vmem>>, %arg12: memref<1x32xf32, #tpu.memory_space<vmem>>, %arg13: memref<1x32xf32, #tpu.memory_space<vmem>>, %arg14: memref<1x32xf32, #tpu.memory_space<vmem>>, %arg15: memref<32x96xf32, #tpu.memory_space<vmem>>, %arg16: memref<1x96xf32, #tpu.memory_space<vmem>>, %arg17: memref<32x32xf32, #tpu.memory_space<vmem>>, %arg18: memref<1x32xf32, #tpu.memory_space<vmem>>, %arg19: memref<1x32xf32, #tpu.memory_space<vmem>>, %arg20: memref<1x32xf32, #tpu.memory_space<vmem>>, %arg21: memref<32x128xf32, #tpu.memory_space<vmem>>, %arg22: memref<1x128xf32, #tpu.memory_space<vmem>>, %arg23: memref<128x32xf32, #tpu.memory_space<vmem>>, %arg24: memref<1x32xf32, #tpu.memory_space<vmem>>, %arg25: memref<1x32xf32, #tpu.memory_space<vmem>>, %arg26: memref<1x32xf32, #tpu.memory_space<vmem>>, %arg27: memref<16x32xf32, #tpu.memory_space<vmem>>) attributes {dimension_semantics = [], scalar_prefetch = 0 : i64, scratch_operands = 0 : i64, tpu.core_type = #tpu.core_type<tc>} {
    %c0 = arith.constant 0 : index
    %c0_0 = arith.constant 0 : index
    %0 = vector.load %arg0[%c0, %c0_0] : memref<16x32xf32, #tpu.memory_space<vmem>>, vector<16x32xf32>
    %c0_1 = arith.constant 0 : index
    %c0_2 = arith.constant 0 : index
    %1 = vector.load %arg1[%c0_1, %c0_2] : memref<1x32xf32, #tpu.memory_space<vmem>>, vector<1x32xf32>
    %c0_3 = arith.constant 0 : index
    %c0_4 = arith.constant 0 : index
    %2 = vector.load %arg2[%c0_3, %c0_4] : memref<1x32xf32, #tpu.memory_space<vmem>>, vector<1x32xf32>
    %cst = arith.constant dense<0.000000e+00> : vector<16xf32>
    %3 = vector.multi_reduction <add>, %0, %cst [1] : vector<16x32xf32> to vector<16xf32>
    %4 = vector.shape_cast %3 : vector<16xf32> to vector<16x1xf32>
    %cst_5 = arith.constant 3.200000e+01 : f32
    %5 = vector.broadcast %cst_5 : f32 to vector<16x1xf32>
    %6 = arith.divf %4, %5 : vector<16x1xf32>
    %7 = vector.broadcast %6 : vector<16x1xf32> to vector<16x32xf32>
    %8 = arith.subf %0, %7 : vector<16x32xf32>
    %9 = arith.mulf %8, %8 : vector<16x32xf32>
    %cst_6 = arith.constant dense<0.000000e+00> : vector<16xf32>
    %10 = vector.multi_reduction <add>, %9, %cst_6 [1] : vector<16x32xf32> to vector<16xf32>
    %11 = vector.shape_cast %10 : vector<16xf32> to vector<16x1xf32>
    %cst_7 = arith.constant 3.200000e+01 : f32
    %12 = vector.broadcast %cst_7 : f32 to vector<16x1xf32>
    %13 = arith.divf %11, %12 : vector<16x1xf32>
    %14 = vector.broadcast %6 : vector<16x1xf32> to vector<16x32xf32>
    %15 = arith.subf %0, %14 : vector<16x32xf32>
    %cst_8 = arith.constant 9.99999996E-13 : f32
    %16 = vector.broadcast %cst_8 : f32 to vector<16x1xf32>
    %17 = arith.addf %13, %16 : vector<16x1xf32>
    %18 = math.rsqrt %17 : vector<16x1xf32>
    %19 = vector.broadcast %18 : vector<16x1xf32> to vector<16x32xf32>
    %20 = arith.mulf %15, %19 : vector<16x32xf32>
    %21 = vector.broadcast %1 : vector<1x32xf32> to vector<16x32xf32>
    %22 = arith.mulf %20, %21 : vector<16x32xf32>
    %23 = vector.broadcast %2 : vector<1x32xf32> to vector<16x32xf32>
    %24 = arith.addf %22, %23 : vector<16x32xf32>
    %c0_9 = arith.constant 0 : index
    %c0_10 = arith.constant 0 : index
    %25 = vector.load %arg3[%c0_9, %c0_10] : memref<32x96xf32, #tpu.memory_space<vmem>>, vector<32x96xf32>
    %c0_11 = arith.constant 0 : index
    %c0_12 = arith.constant 0 : index
    %26 = vector.load %arg4[%c0_11, %c0_12] : memref<1x96xf32, #tpu.memory_space<vmem>>, vector<1x96xf32>
    %c0_13 = arith.constant 0 : index
    %c0_14 = arith.constant 0 : index
    %27 = vector.load %arg5[%c0_13, %c0_14] : memref<32x32xf32, #tpu.memory_space<vmem>>, vector<32x32xf32>
    %c0_15 = arith.constant 0 : index
    %c0_16 = arith.constant 0 : index
    %28 = vector.load %arg6[%c0_15, %c0_16] : memref<1x32xf32, #tpu.memory_space<vmem>>, vector<1x32xf32>
    %c0_17 = arith.constant 0 : index
    %c0_18 = arith.constant 0 : index
    %29 = vector.load %arg7[%c0_17, %c0_18] : memref<1x32xf32, #tpu.memory_space<vmem>>, vector<1x32xf32>
    %c0_19 = arith.constant 0 : index
    %c0_20 = arith.constant 0 : index
    %30 = vector.load %arg8[%c0_19, %c0_20] : memref<1x32xf32, #tpu.memory_space<vmem>>, vector<1x32xf32>
    %c0_21 = arith.constant 0 : index
    %c0_22 = arith.constant 0 : index
    %31 = vector.load %arg9[%c0_21, %c0_22] : memref<32x128xf32, #tpu.memory_space<vmem>>, vector<32x128xf32>
    %c0_23 = arith.constant 0 : index
    %c0_24 = arith.constant 0 : index
    %32 = vector.load %arg10[%c0_23, %c0_24] : memref<1x128xf32, #tpu.memory_space<vmem>>, vector<1x128xf32>
    %c0_25 = arith.constant 0 : index
    %c0_26 = arith.constant 0 : index
    %33 = vector.load %arg11[%c0_25, %c0_26] : memref<128x32xf32, #tpu.memory_space<vmem>>, vector<128x32xf32>
    %c0_27 = arith.constant 0 : index
    %c0_28 = arith.constant 0 : index
    %34 = vector.load %arg12[%c0_27, %c0_28] : memref<1x32xf32, #tpu.memory_space<vmem>>, vector<1x32xf32>
    %c0_29 = arith.constant 0 : index
    %c0_30 = arith.constant 0 : index
    %35 = vector.load %arg13[%c0_29, %c0_30] : memref<1x32xf32, #tpu.memory_space<vmem>>, vector<1x32xf32>
    %c0_31 = arith.constant 0 : index
    %c0_32 = arith.constant 0 : index
    %36 = vector.load %arg14[%c0_31, %c0_32] : memref<1x32xf32, #tpu.memory_space<vmem>>, vector<1x32xf32>
    %cst_33 = arith.constant dense<0.000000e+00> : vector<16x96xf32>
    %37 = tpu.matmul %24, %25, %cst_33 {dimension_numbers = #tpu.dot_dimension_numbers<[1], [0], [0], [1], [0, 0, 1, 1], [], []>} : vector<16x32xf32>, vector<32x96xf32>, vector<16x96xf32> -> vector<16x96xf32>
    %38 = vector.broadcast %26 : vector<1x96xf32> to vector<16x96xf32>
    %39 = arith.addf %37, %38 : vector<16x96xf32>
    %40 = vector.extract_strided_slice %39 {offsets = [0, 0], sizes = [16, 32], strides = [1, 1]} : vector<16x96xf32> to vector<16x32xf32>
    %41 = vector.shape_cast %40 : vector<16x32xf32> to vector<2x8x32xf32>
    %42 = vector.extract_strided_slice %39 {offsets = [0, 32], sizes = [16, 32], strides = [1, 1]} : vector<16x96xf32> to vector<16x32xf32>
    %43 = vector.shape_cast %42 : vector<16x32xf32> to vector<2x8x32xf32>
    %44 = vector.extract_strided_slice %39 {offsets = [0, 64], sizes = [16, 32], strides = [1, 1]} : vector<16x96xf32> to vector<16x32xf32>
    %45 = vector.shape_cast %44 : vector<16x32xf32> to vector<2x8x32xf32>
    %46 = vector.extract_strided_slice %41 {offsets = [0, 0, 0], sizes = [2, 8, 8], strides = [1, 1, 1]} : vector<2x8x32xf32> to vector<2x8x8xf32>
    %47 = vector.extract_strided_slice %43 {offsets = [0, 0, 0], sizes = [2, 8, 8], strides = [1, 1, 1]} : vector<2x8x32xf32> to vector<2x8x8xf32>
    %48 = vector.extract_strided_slice %45 {offsets = [0, 0, 0], sizes = [2, 8, 8], strides = [1, 1, 1]} : vector<2x8x32xf32> to vector<2x8x8xf32>
    "tpu.trace_start"() <{level = 10 : i32, message = "bqd,bkd->bqk"}> : () -> ()
    %cst_34 = arith.constant dense<0.000000e+00> : vector<2x8x8xf32>
    %49 = tpu.matmul %46, %47, %cst_34 {dimension_numbers = #tpu.dot_dimension_numbers<[2], [2], [1], [1], [0, 0, 0, 1, 1, 1], [0], [0]>} : vector<2x8x8xf32>, vector<2x8x8xf32>, vector<2x8x8xf32> -> vector<2x8x8xf32>
    "tpu.trace_stop"() : () -> ()
    %cst_35 = arith.constant 0.353553385 : f32
    %50 = vector.broadcast %cst_35 : f32 to vector<2x8x8xf32>
    %51 = arith.mulf %49, %50 : vector<2x8x8xf32>
    %cst_36 = arith.constant dense<0xFF800000> : vector<2x8xf32>
    %52 = vector.multi_reduction <maximumf>, %51, %cst_36 [2] : vector<2x8x8xf32> to vector<2x8xf32>
    %53 = vector.shape_cast %52 : vector<2x8xf32> to vector<2x8x1xf32>
    %54 = vector.broadcast %53 : vector<2x8x1xf32> to vector<2x8x8xf32>
    %55 = arith.subf %51, %54 : vector<2x8x8xf32>
    %56 = math.exp %55 : vector<2x8x8xf32>
    %cst_37 = arith.constant dense<0.000000e+00> : vector<2x8xf32>
    %57 = vector.multi_reduction <add>, %56, %cst_37 [2] : vector<2x8x8xf32> to vector<2x8xf32>
    %58 = vector.shape_cast %57 : vector<2x8xf32> to vector<2x8x1xf32>
    %59 = tpu.reciprocal %58 {approx = true} : vector<2x8x1xf32> -> vector<2x8x1xf32>
    %60 = vector.broadcast %59 : vector<2x8x1xf32> to vector<2x8x8xf32>
    %61 = arith.mulf %56, %60 : vector<2x8x8xf32>
    "tpu.trace_start"() <{level = 10 : i32, message = "bqk,bkd->bqd"}> : () -> ()
    %cst_38 = arith.constant dense<0.000000e+00> : vector<2x8x8xf32>
    %62 = tpu.matmul %61, %48, %cst_38 {dimension_numbers = #tpu.dot_dimension_numbers<[2], [1], [1], [2], [0, 0, 0, 1, 1, 2], [0], [0]>} : vector<2x8x8xf32>, vector<2x8x8xf32>, vector<2x8x8xf32> -> vector<2x8x8xf32>
    "tpu.trace_stop"() : () -> ()
    %63 = vector.extract_strided_slice %41 {offsets = [0, 0, 8], sizes = [2, 8, 8], strides = [1, 1, 1]} : vector<2x8x32xf32> to vector<2x8x8xf32>
    %64 = vector.extract_strided_slice %43 {offsets = [0, 0, 8], sizes = [2, 8, 8], strides = [1, 1, 1]} : vector<2x8x32xf32> to vector<2x8x8xf32>
    %65 = vector.extract_strided_slice %45 {offsets = [0, 0, 8], sizes = [2, 8, 8], strides = [1, 1, 1]} : vector<2x8x32xf32> to vector<2x8x8xf32>
    "tpu.trace_start"() <{level = 10 : i32, message = "bqd,bkd->bqk"}> : () -> ()
    %cst_39 = arith.constant dense<0.000000e+00> : vector<2x8x8xf32>
    %66 = tpu.matmul %63, %64, %cst_39 {dimension_numbers = #tpu.dot_dimension_numbers<[2], [2], [1], [1], [0, 0, 0, 1, 1, 1], [0], [0]>} : vector<2x8x8xf32>, vector<2x8x8xf32>, vector<2x8x8xf32> -> vector<2x8x8xf32>
    "tpu.trace_stop"() : () -> ()
    %cst_40 = arith.constant 0.353553385 : f32
    %67 = vector.broadcast %cst_40 : f32 to vector<2x8x8xf32>
    %68 = arith.mulf %66, %67 : vector<2x8x8xf32>
    %cst_41 = arith.constant dense<0xFF800000> : vector<2x8xf32>
    %69 = vector.multi_reduction <maximumf>, %68, %cst_41 [2] : vector<2x8x8xf32> to vector<2x8xf32>
    %70 = vector.shape_cast %69 : vector<2x8xf32> to vector<2x8x1xf32>
    %71 = vector.broadcast %70 : vector<2x8x1xf32> to vector<2x8x8xf32>
    %72 = arith.subf %68, %71 : vector<2x8x8xf32>
    %73 = math.exp %72 : vector<2x8x8xf32>
    %cst_42 = arith.constant dense<0.000000e+00> : vector<2x8xf32>
    %74 = vector.multi_reduction <add>, %73, %cst_42 [2] : vector<2x8x8xf32> to vector<2x8xf32>
    %75 = vector.shape_cast %74 : vector<2x8xf32> to vector<2x8x1xf32>
    %76 = tpu.reciprocal %75 {approx = true} : vector<2x8x1xf32> -> vector<2x8x1xf32>
    %77 = vector.broadcast %76 : vector<2x8x1xf32> to vector<2x8x8xf32>
    %78 = arith.mulf %73, %77 : vector<2x8x8xf32>
    "tpu.trace_start"() <{level = 10 : i32, message = "bqk,bkd->bqd"}> : () -> ()
    %cst_43 = arith.constant dense<0.000000e+00> : vector<2x8x8xf32>
    %79 = tpu.matmul %78, %65, %cst_43 {dimension_numbers = #tpu.dot_dimension_numbers<[2], [1], [1], [2], [0, 0, 0, 1, 1, 2], [0], [0]>} : vector<2x8x8xf32>, vector<2x8x8xf32>, vector<2x8x8xf32> -> vector<2x8x8xf32>
    "tpu.trace_stop"() : () -> ()
    %80 = vector.extract_strided_slice %41 {offsets = [0, 0, 16], sizes = [2, 8, 8], strides = [1, 1, 1]} : vector<2x8x32xf32> to vector<2x8x8xf32>
    %81 = vector.extract_strided_slice %43 {offsets = [0, 0, 16], sizes = [2, 8, 8], strides = [1, 1, 1]} : vector<2x8x32xf32> to vector<2x8x8xf32>
    %82 = vector.extract_strided_slice %45 {offsets = [0, 0, 16], sizes = [2, 8, 8], strides = [1, 1, 1]} : vector<2x8x32xf32> to vector<2x8x8xf32>
    "tpu.trace_start"() <{level = 10 : i32, message = "bqd,bkd->bqk"}> : () -> ()
    %cst_44 = arith.constant dense<0.000000e+00> : vector<2x8x8xf32>
    %83 = tpu.matmul %80, %81, %cst_44 {dimension_numbers = #tpu.dot_dimension_numbers<[2], [2], [1], [1], [0, 0, 0, 1, 1, 1], [0], [0]>} : vector<2x8x8xf32>, vector<2x8x8xf32>, vector<2x8x8xf32> -> vector<2x8x8xf32>
    "tpu.trace_stop"() : () -> ()
    %cst_45 = arith.constant 0.353553385 : f32
    %84 = vector.broadcast %cst_45 : f32 to vector<2x8x8xf32>
    %85 = arith.mulf %83, %84 : vector<2x8x8xf32>
    %cst_46 = arith.constant dense<0xFF800000> : vector<2x8xf32>
    %86 = vector.multi_reduction <maximumf>, %85, %cst_46 [2] : vector<2x8x8xf32> to vector<2x8xf32>
    %87 = vector.shape_cast %86 : vector<2x8xf32> to vector<2x8x1xf32>
    %88 = vector.broadcast %87 : vector<2x8x1xf32> to vector<2x8x8xf32>
    %89 = arith.subf %85, %88 : vector<2x8x8xf32>
    %90 = math.exp %89 : vector<2x8x8xf32>
    %cst_47 = arith.constant dense<0.000000e+00> : vector<2x8xf32>
    %91 = vector.multi_reduction <add>, %90, %cst_47 [2] : vector<2x8x8xf32> to vector<2x8xf32>
    %92 = vector.shape_cast %91 : vector<2x8xf32> to vector<2x8x1xf32>
    %93 = tpu.reciprocal %92 {approx = true} : vector<2x8x1xf32> -> vector<2x8x1xf32>
    %94 = vector.broadcast %93 : vector<2x8x1xf32> to vector<2x8x8xf32>
    %95 = arith.mulf %90, %94 : vector<2x8x8xf32>
    "tpu.trace_start"() <{level = 10 : i32, message = "bqk,bkd->bqd"}> : () -> ()
    %cst_48 = arith.constant dense<0.000000e+00> : vector<2x8x8xf32>
    %96 = tpu.matmul %95, %82, %cst_48 {dimension_numbers = #tpu.dot_dimension_numbers<[2], [1], [1], [2], [0, 0, 0, 1, 1, 2], [0], [0]>} : vector<2x8x8xf32>, vector<2x8x8xf32>, vector<2x8x8xf32> -> vector<2x8x8xf32>
    "tpu.trace_stop"() : () -> ()
    %97 = vector.extract_strided_slice %41 {offsets = [0, 0, 24], sizes = [2, 8, 8], strides = [1, 1, 1]} : vector<2x8x32xf32> to vector<2x8x8xf32>
    %98 = vector.extract_strided_slice %43 {offsets = [0, 0, 24], sizes = [2, 8, 8], strides = [1, 1, 1]} : vector<2x8x32xf32> to vector<2x8x8xf32>
    %99 = vector.extract_strided_slice %45 {offsets = [0, 0, 24], sizes = [2, 8, 8], strides = [1, 1, 1]} : vector<2x8x32xf32> to vector<2x8x8xf32>
    "tpu.trace_start"() <{level = 10 : i32, message = "bqd,bkd->bqk"}> : () -> ()
    %cst_49 = arith.constant dense<0.000000e+00> : vector<2x8x8xf32>
    %100 = tpu.matmul %97, %98, %cst_49 {dimension_numbers = #tpu.dot_dimension_numbers<[2], [2], [1], [1], [0, 0, 0, 1, 1, 1], [0], [0]>} : vector<2x8x8xf32>, vector<2x8x8xf32>, vector<2x8x8xf32> -> vector<2x8x8xf32>
    "tpu.trace_stop"() : () -> ()
    %cst_50 = arith.constant 0.353553385 : f32
    %101 = vector.broadcast %cst_50 : f32 to vector<2x8x8xf32>
    %102 = arith.mulf %100, %101 : vector<2x8x8xf32>
    %cst_51 = arith.constant dense<0xFF800000> : vector<2x8xf32>
    %103 = vector.multi_reduction <maximumf>, %102, %cst_51 [2] : vector<2x8x8xf32> to vector<2x8xf32>
    %104 = vector.shape_cast %103 : vector<2x8xf32> to vector<2x8x1xf32>
    %105 = vector.broadcast %104 : vector<2x8x1xf32> to vector<2x8x8xf32>
    %106 = arith.subf %102, %105 : vector<2x8x8xf32>
    %107 = math.exp %106 : vector<2x8x8xf32>
    %cst_52 = arith.constant dense<0.000000e+00> : vector<2x8xf32>
    %108 = vector.multi_reduction <add>, %107, %cst_52 [2] : vector<2x8x8xf32> to vector<2x8xf32>
    %109 = vector.shape_cast %108 : vector<2x8xf32> to vector<2x8x1xf32>
    %110 = tpu.reciprocal %109 {approx = true} : vector<2x8x1xf32> -> vector<2x8x1xf32>
    %111 = vector.broadcast %110 : vector<2x8x1xf32> to vector<2x8x8xf32>
    %112 = arith.mulf %107, %111 : vector<2x8x8xf32>
    "tpu.trace_start"() <{level = 10 : i32, message = "bqk,bkd->bqd"}> : () -> ()
    %cst_53 = arith.constant dense<0.000000e+00> : vector<2x8x8xf32>
    %113 = tpu.matmul %112, %99, %cst_53 {dimension_numbers = #tpu.dot_dimension_numbers<[2], [1], [1], [2], [0, 0, 0, 1, 1, 2], [0], [0]>} : vector<2x8x8xf32>, vector<2x8x8xf32>, vector<2x8x8xf32> -> vector<2x8x8xf32>
    "tpu.trace_stop"() : () -> ()
    %114 = tpu.concatenate %62, %79, %96, %113 in 2 : vector<2x8x8xf32>, vector<2x8x8xf32>, vector<2x8x8xf32>, vector<2x8x8xf32> -> vector<2x8x32xf32>
    %115 = vector.shape_cast %114 : vector<2x8x32xf32> to vector<16x32xf32>
    %cst_54 = arith.constant dense<0.000000e+00> : vector<16x32xf32>
    %116 = tpu.matmul %115, %27, %cst_54 {dimension_numbers = #tpu.dot_dimension_numbers<[1], [0], [0], [1], [0, 0, 1, 1], [], []>} : vector<16x32xf32>, vector<32x32xf32>, vector<16x32xf32> -> vector<16x32xf32>
    %117 = vector.broadcast %28 : vector<1x32xf32> to vector<16x32xf32>
    %118 = arith.addf %116, %117 : vector<16x32xf32>
    %119 = arith.addf %24, %118 : vector<16x32xf32>
    %cst_55 = arith.constant dense<0.000000e+00> : vector<16xf32>
    %120 = vector.multi_reduction <add>, %119, %cst_55 [1] : vector<16x32xf32> to vector<16xf32>
    %121 = vector.shape_cast %120 : vector<16xf32> to vector<16x1xf32>
    %cst_56 = arith.constant 3.200000e+01 : f32
    %122 = vector.broadcast %cst_56 : f32 to vector<16x1xf32>
    %123 = arith.divf %121, %122 : vector<16x1xf32>
    %124 = vector.broadcast %123 : vector<16x1xf32> to vector<16x32xf32>
    %125 = arith.subf %119, %124 : vector<16x32xf32>
    %126 = arith.mulf %125, %125 : vector<16x32xf32>
    %cst_57 = arith.constant dense<0.000000e+00> : vector<16xf32>
    %127 = vector.multi_reduction <add>, %126, %cst_57 [1] : vector<16x32xf32> to vector<16xf32>
    %128 = vector.shape_cast %127 : vector<16xf32> to vector<16x1xf32>
    %cst_58 = arith.constant 3.200000e+01 : f32
    %129 = vector.broadcast %cst_58 : f32 to vector<16x1xf32>
    %130 = arith.divf %128, %129 : vector<16x1xf32>
    %131 = vector.broadcast %123 : vector<16x1xf32> to vector<16x32xf32>
    %132 = arith.subf %119, %131 : vector<16x32xf32>
    %cst_59 = arith.constant 9.99999996E-13 : f32
    %133 = vector.broadcast %cst_59 : f32 to vector<16x1xf32>
    %134 = arith.addf %130, %133 : vector<16x1xf32>
    %135 = math.rsqrt %134 : vector<16x1xf32>
    %136 = vector.broadcast %135 : vector<16x1xf32> to vector<16x32xf32>
    %137 = arith.mulf %132, %136 : vector<16x32xf32>
    %138 = vector.broadcast %29 : vector<1x32xf32> to vector<16x32xf32>
    %139 = arith.mulf %137, %138 : vector<16x32xf32>
    %140 = vector.broadcast %30 : vector<1x32xf32> to vector<16x32xf32>
    %141 = arith.addf %139, %140 : vector<16x32xf32>
    %cst_60 = arith.constant dense<0.000000e+00> : vector<16x128xf32>
    %142 = tpu.matmul %141, %31, %cst_60 {dimension_numbers = #tpu.dot_dimension_numbers<[1], [0], [0], [1], [0, 0, 1, 1], [], []>} : vector<16x32xf32>, vector<32x128xf32>, vector<16x128xf32> -> vector<16x128xf32>
    %143 = vector.broadcast %32 : vector<1x128xf32> to vector<16x128xf32>
    %144 = arith.addf %142, %143 : vector<16x128xf32>
    %cst_61 = arith.constant 5.000000e-01 : f32
    %145 = vector.broadcast %cst_61 : f32 to vector<16x128xf32>
    %146 = arith.mulf %145, %144 : vector<16x128xf32>
    %cst_62 = arith.constant 4.471500e-02 : f32
    %147 = vector.broadcast %cst_62 : f32 to vector<16x128xf32>
    %148 = arith.mulf %147, %144 : vector<16x128xf32>
    %149 = arith.mulf %148, %144 : vector<16x128xf32>
    %150 = arith.mulf %149, %144 : vector<16x128xf32>
    %151 = arith.addf %144, %150 : vector<16x128xf32>
    %cst_63 = arith.constant 0.797884583 : f32
    %152 = vector.broadcast %cst_63 : f32 to vector<16x128xf32>
    %153 = arith.mulf %152, %151 : vector<16x128xf32>
    %154 = math.tanh %153 : vector<16x128xf32>
    %cst_64 = arith.constant 1.000000e+00 : f32
    %155 = vector.broadcast %cst_64 : f32 to vector<16x128xf32>
    %156 = arith.addf %155, %154 : vector<16x128xf32>
    %157 = arith.mulf %146, %156 : vector<16x128xf32>
    %cst_65 = arith.constant dense<0.000000e+00> : vector<16x32xf32>
    %158 = tpu.matmul %157, %33, %cst_65 {dimension_numbers = #tpu.dot_dimension_numbers<[1], [0], [0], [1], [0, 0, 1, 1], [], []>} : vector<16x128xf32>, vector<128x32xf32>, vector<16x32xf32> -> vector<16x32xf32>
    %159 = vector.broadcast %34 : vector<1x32xf32> to vector<16x32xf32>
    %160 = arith.addf %158, %159 : vector<16x32xf32>
    %161 = arith.addf %141, %160 : vector<16x32xf32>
    %cst_66 = arith.constant dense<0.000000e+00> : vector<16xf32>
    %162 = vector.multi_reduction <add>, %161, %cst_66 [1] : vector<16x32xf32> to vector<16xf32>
    %163 = vector.shape_cast %162 : vector<16xf32> to vector<16x1xf32>
    %cst_67 = arith.constant 3.200000e+01 : f32
    %164 = vector.broadcast %cst_67 : f32 to vector<16x1xf32>
    %165 = arith.divf %163, %164 : vector<16x1xf32>
    %166 = vector.broadcast %165 : vector<16x1xf32> to vector<16x32xf32>
    %167 = arith.subf %161, %166 : vector<16x32xf32>
    %168 = arith.mulf %167, %167 : vector<16x32xf32>
    %cst_68 = arith.constant dense<0.000000e+00> : vector<16xf32>
    %169 = vector.multi_reduction <add>, %168, %cst_68 [1] : vector<16x32xf32> to vector<16xf32>
    %170 = vector.shape_cast %169 : vector<16xf32> to vector<16x1xf32>
    %cst_69 = arith.constant 3.200000e+01 : f32
    %171 = vector.broadcast %cst_69 : f32 to vector<16x1xf32>
    %172 = arith.divf %170, %171 : vector<16x1xf32>
    %173 = vector.broadcast %165 : vector<16x1xf32> to vector<16x32xf32>
    %174 = arith.subf %161, %173 : vector<16x32xf32>
    %cst_70 = arith.constant 9.99999996E-13 : f32
    %175 = vector.broadcast %cst_70 : f32 to vector<16x1xf32>
    %176 = arith.addf %172, %175 : vector<16x1xf32>
    %177 = math.rsqrt %176 : vector<16x1xf32>
    %178 = vector.broadcast %177 : vector<16x1xf32> to vector<16x32xf32>
    %179 = arith.mulf %174, %178 : vector<16x32xf32>
    %180 = vector.broadcast %35 : vector<1x32xf32> to vector<16x32xf32>
    %181 = arith.mulf %179, %180 : vector<16x32xf32>
    %182 = vector.broadcast %36 : vector<1x32xf32> to vector<16x32xf32>
    %183 = arith.addf %181, %182 : vector<16x32xf32>
    %c0_71 = arith.constant 0 : index
    %c0_72 = arith.constant 0 : index
    %184 = vector.load %arg15[%c0_71, %c0_72] : memref<32x96xf32, #tpu.memory_space<vmem>>, vector<32x96xf32>
    %c0_73 = arith.constant 0 : index
    %c0_74 = arith.constant 0 : index
    %185 = vector.load %arg16[%c0_73, %c0_74] : memref<1x96xf32, #tpu.memory_space<vmem>>, vector<1x96xf32>
    %c0_75 = arith.constant 0 : index
    %c0_76 = arith.constant 0 : index
    %186 = vector.load %arg17[%c0_75, %c0_76] : memref<32x32xf32, #tpu.memory_space<vmem>>, vector<32x32xf32>
    %c0_77 = arith.constant 0 : index
    %c0_78 = arith.constant 0 : index
    %187 = vector.load %arg18[%c0_77, %c0_78] : memref<1x32xf32, #tpu.memory_space<vmem>>, vector<1x32xf32>
    %c0_79 = arith.constant 0 : index
    %c0_80 = arith.constant 0 : index
    %188 = vector.load %arg19[%c0_79, %c0_80] : memref<1x32xf32, #tpu.memory_space<vmem>>, vector<1x32xf32>
    %c0_81 = arith.constant 0 : index
    %c0_82 = arith.constant 0 : index
    %189 = vector.load %arg20[%c0_81, %c0_82] : memref<1x32xf32, #tpu.memory_space<vmem>>, vector<1x32xf32>
    %c0_83 = arith.constant 0 : index
    %c0_84 = arith.constant 0 : index
    %190 = vector.load %arg21[%c0_83, %c0_84] : memref<32x128xf32, #tpu.memory_space<vmem>>, vector<32x128xf32>
    %c0_85 = arith.constant 0 : index
    %c0_86 = arith.constant 0 : index
    %191 = vector.load %arg22[%c0_85, %c0_86] : memref<1x128xf32, #tpu.memory_space<vmem>>, vector<1x128xf32>
    %c0_87 = arith.constant 0 : index
    %c0_88 = arith.constant 0 : index
    %192 = vector.load %arg23[%c0_87, %c0_88] : memref<128x32xf32, #tpu.memory_space<vmem>>, vector<128x32xf32>
    %c0_89 = arith.constant 0 : index
    %c0_90 = arith.constant 0 : index
    %193 = vector.load %arg24[%c0_89, %c0_90] : memref<1x32xf32, #tpu.memory_space<vmem>>, vector<1x32xf32>
    %c0_91 = arith.constant 0 : index
    %c0_92 = arith.constant 0 : index
    %194 = vector.load %arg25[%c0_91, %c0_92] : memref<1x32xf32, #tpu.memory_space<vmem>>, vector<1x32xf32>
    %c0_93 = arith.constant 0 : index
    %c0_94 = arith.constant 0 : index
    %195 = vector.load %arg26[%c0_93, %c0_94] : memref<1x32xf32, #tpu.memory_space<vmem>>, vector<1x32xf32>
    %cst_95 = arith.constant dense<0.000000e+00> : vector<16x96xf32>
    %196 = tpu.matmul %183, %184, %cst_95 {dimension_numbers = #tpu.dot_dimension_numbers<[1], [0], [0], [1], [0, 0, 1, 1], [], []>} : vector<16x32xf32>, vector<32x96xf32>, vector<16x96xf32> -> vector<16x96xf32>
    %197 = vector.broadcast %185 : vector<1x96xf32> to vector<16x96xf32>
    %198 = arith.addf %196, %197 : vector<16x96xf32>
    %199 = vector.extract_strided_slice %198 {offsets = [0, 0], sizes = [16, 32], strides = [1, 1]} : vector<16x96xf32> to vector<16x32xf32>
    %200 = vector.shape_cast %199 : vector<16x32xf32> to vector<2x8x32xf32>
    %201 = vector.extract_strided_slice %198 {offsets = [0, 32], sizes = [16, 32], strides = [1, 1]} : vector<16x96xf32> to vector<16x32xf32>
    %202 = vector.shape_cast %201 : vector<16x32xf32> to vector<2x8x32xf32>
    %203 = vector.extract_strided_slice %198 {offsets = [0, 64], sizes = [16, 32], strides = [1, 1]} : vector<16x96xf32> to vector<16x32xf32>
    %204 = vector.shape_cast %203 : vector<16x32xf32> to vector<2x8x32xf32>
    %205 = vector.extract_strided_slice %200 {offsets = [0, 0, 0], sizes = [2, 8, 8], strides = [1, 1, 1]} : vector<2x8x32xf32> to vector<2x8x8xf32>
    %206 = vector.extract_strided_slice %202 {offsets = [0, 0, 0], sizes = [2, 8, 8], strides = [1, 1, 1]} : vector<2x8x32xf32> to vector<2x8x8xf32>
    %207 = vector.extract_strided_slice %204 {offsets = [0, 0, 0], sizes = [2, 8, 8], strides = [1, 1, 1]} : vector<2x8x32xf32> to vector<2x8x8xf32>
    "tpu.trace_start"() <{level = 10 : i32, message = "bqd,bkd->bqk"}> : () -> ()
    %cst_96 = arith.constant dense<0.000000e+00> : vector<2x8x8xf32>
    %208 = tpu.matmul %205, %206, %cst_96 {dimension_numbers = #tpu.dot_dimension_numbers<[2], [2], [1], [1], [0, 0, 0, 1, 1, 1], [0], [0]>} : vector<2x8x8xf32>, vector<2x8x8xf32>, vector<2x8x8xf32> -> vector<2x8x8xf32>
    "tpu.trace_stop"() : () -> ()
    %cst_97 = arith.constant 0.353553385 : f32
    %209 = vector.broadcast %cst_97 : f32 to vector<2x8x8xf32>
    %210 = arith.mulf %208, %209 : vector<2x8x8xf32>
    %cst_98 = arith.constant dense<0xFF800000> : vector<2x8xf32>
    %211 = vector.multi_reduction <maximumf>, %210, %cst_98 [2] : vector<2x8x8xf32> to vector<2x8xf32>
    %212 = vector.shape_cast %211 : vector<2x8xf32> to vector<2x8x1xf32>
    %213 = vector.broadcast %212 : vector<2x8x1xf32> to vector<2x8x8xf32>
    %214 = arith.subf %210, %213 : vector<2x8x8xf32>
    %215 = math.exp %214 : vector<2x8x8xf32>
    %cst_99 = arith.constant dense<0.000000e+00> : vector<2x8xf32>
    %216 = vector.multi_reduction <add>, %215, %cst_99 [2] : vector<2x8x8xf32> to vector<2x8xf32>
    %217 = vector.shape_cast %216 : vector<2x8xf32> to vector<2x8x1xf32>
    %218 = tpu.reciprocal %217 {approx = true} : vector<2x8x1xf32> -> vector<2x8x1xf32>
    %219 = vector.broadcast %218 : vector<2x8x1xf32> to vector<2x8x8xf32>
    %220 = arith.mulf %215, %219 : vector<2x8x8xf32>
    "tpu.trace_start"() <{level = 10 : i32, message = "bqk,bkd->bqd"}> : () -> ()
    %cst_100 = arith.constant dense<0.000000e+00> : vector<2x8x8xf32>
    %221 = tpu.matmul %220, %207, %cst_100 {dimension_numbers = #tpu.dot_dimension_numbers<[2], [1], [1], [2], [0, 0, 0, 1, 1, 2], [0], [0]>} : vector<2x8x8xf32>, vector<2x8x8xf32>, vector<2x8x8xf32> -> vector<2x8x8xf32>
    "tpu.trace_stop"() : () -> ()
    %222 = vector.extract_strided_slice %200 {offsets = [0, 0, 8], sizes = [2, 8, 8], strides = [1, 1, 1]} : vector<2x8x32xf32> to vector<2x8x8xf32>
    %223 = vector.extract_strided_slice %202 {offsets = [0, 0, 8], sizes = [2, 8, 8], strides = [1, 1, 1]} : vector<2x8x32xf32> to vector<2x8x8xf32>
    %224 = vector.extract_strided_slice %204 {offsets = [0, 0, 8], sizes = [2, 8, 8], strides = [1, 1, 1]} : vector<2x8x32xf32> to vector<2x8x8xf32>
    "tpu.trace_start"() <{level = 10 : i32, message = "bqd,bkd->bqk"}> : () -> ()
    %cst_101 = arith.constant dense<0.000000e+00> : vector<2x8x8xf32>
    %225 = tpu.matmul %222, %223, %cst_101 {dimension_numbers = #tpu.dot_dimension_numbers<[2], [2], [1], [1], [0, 0, 0, 1, 1, 1], [0], [0]>} : vector<2x8x8xf32>, vector<2x8x8xf32>, vector<2x8x8xf32> -> vector<2x8x8xf32>
    "tpu.trace_stop"() : () -> ()
    %cst_102 = arith.constant 0.353553385 : f32
    %226 = vector.broadcast %cst_102 : f32 to vector<2x8x8xf32>
    %227 = arith.mulf %225, %226 : vector<2x8x8xf32>
    %cst_103 = arith.constant dense<0xFF800000> : vector<2x8xf32>
    %228 = vector.multi_reduction <maximumf>, %227, %cst_103 [2] : vector<2x8x8xf32> to vector<2x8xf32>
    %229 = vector.shape_cast %228 : vector<2x8xf32> to vector<2x8x1xf32>
    %230 = vector.broadcast %229 : vector<2x8x1xf32> to vector<2x8x8xf32>
    %231 = arith.subf %227, %230 : vector<2x8x8xf32>
    %232 = math.exp %231 : vector<2x8x8xf32>
    %cst_104 = arith.constant dense<0.000000e+00> : vector<2x8xf32>
    %233 = vector.multi_reduction <add>, %232, %cst_104 [2] : vector<2x8x8xf32> to vector<2x8xf32>
    %234 = vector.shape_cast %233 : vector<2x8xf32> to vector<2x8x1xf32>
    %235 = tpu.reciprocal %234 {approx = true} : vector<2x8x1xf32> -> vector<2x8x1xf32>
    %236 = vector.broadcast %235 : vector<2x8x1xf32> to vector<2x8x8xf32>
    %237 = arith.mulf %232, %236 : vector<2x8x8xf32>
    "tpu.trace_start"() <{level = 10 : i32, message = "bqk,bkd->bqd"}> : () -> ()
    %cst_105 = arith.constant dense<0.000000e+00> : vector<2x8x8xf32>
    %238 = tpu.matmul %237, %224, %cst_105 {dimension_numbers = #tpu.dot_dimension_numbers<[2], [1], [1], [2], [0, 0, 0, 1, 1, 2], [0], [0]>} : vector<2x8x8xf32>, vector<2x8x8xf32>, vector<2x8x8xf32> -> vector<2x8x8xf32>
    "tpu.trace_stop"() : () -> ()
    %239 = vector.extract_strided_slice %200 {offsets = [0, 0, 16], sizes = [2, 8, 8], strides = [1, 1, 1]} : vector<2x8x32xf32> to vector<2x8x8xf32>
    %240 = vector.extract_strided_slice %202 {offsets = [0, 0, 16], sizes = [2, 8, 8], strides = [1, 1, 1]} : vector<2x8x32xf32> to vector<2x8x8xf32>
    %241 = vector.extract_strided_slice %204 {offsets = [0, 0, 16], sizes = [2, 8, 8], strides = [1, 1, 1]} : vector<2x8x32xf32> to vector<2x8x8xf32>
    "tpu.trace_start"() <{level = 10 : i32, message = "bqd,bkd->bqk"}> : () -> ()
    %cst_106 = arith.constant dense<0.000000e+00> : vector<2x8x8xf32>
    %242 = tpu.matmul %239, %240, %cst_106 {dimension_numbers = #tpu.dot_dimension_numbers<[2], [2], [1], [1], [0, 0, 0, 1, 1, 1], [0], [0]>} : vector<2x8x8xf32>, vector<2x8x8xf32>, vector<2x8x8xf32> -> vector<2x8x8xf32>
    "tpu.trace_stop"() : () -> ()
    %cst_107 = arith.constant 0.353553385 : f32
    %243 = vector.broadcast %cst_107 : f32 to vector<2x8x8xf32>
    %244 = arith.mulf %242, %243 : vector<2x8x8xf32>
    %cst_108 = arith.constant dense<0xFF800000> : vector<2x8xf32>
    %245 = vector.multi_reduction <maximumf>, %244, %cst_108 [2] : vector<2x8x8xf32> to vector<2x8xf32>
    %246 = vector.shape_cast %245 : vector<2x8xf32> to vector<2x8x1xf32>
    %247 = vector.broadcast %246 : vector<2x8x1xf32> to vector<2x8x8xf32>
    %248 = arith.subf %244, %247 : vector<2x8x8xf32>
    %249 = math.exp %248 : vector<2x8x8xf32>
    %cst_109 = arith.constant dense<0.000000e+00> : vector<2x8xf32>
    %250 = vector.multi_reduction <add>, %249, %cst_109 [2] : vector<2x8x8xf32> to vector<2x8xf32>
    %251 = vector.shape_cast %250 : vector<2x8xf32> to vector<2x8x1xf32>
    %252 = tpu.reciprocal %251 {approx = true} : vector<2x8x1xf32> -> vector<2x8x1xf32>
    %253 = vector.broadcast %252 : vector<2x8x1xf32> to vector<2x8x8xf32>
    %254 = arith.mulf %249, %253 : vector<2x8x8xf32>
    "tpu.trace_start"() <{level = 10 : i32, message = "bqk,bkd->bqd"}> : () -> ()
    %cst_110 = arith.constant dense<0.000000e+00> : vector<2x8x8xf32>
    %255 = tpu.matmul %254, %241, %cst_110 {dimension_numbers = #tpu.dot_dimension_numbers<[2], [1], [1], [2], [0, 0, 0, 1, 1, 2], [0], [0]>} : vector<2x8x8xf32>, vector<2x8x8xf32>, vector<2x8x8xf32> -> vector<2x8x8xf32>
    "tpu.trace_stop"() : () -> ()
    %256 = vector.extract_strided_slice %200 {offsets = [0, 0, 24], sizes = [2, 8, 8], strides = [1, 1, 1]} : vector<2x8x32xf32> to vector<2x8x8xf32>
    %257 = vector.extract_strided_slice %202 {offsets = [0, 0, 24], sizes = [2, 8, 8], strides = [1, 1, 1]} : vector<2x8x32xf32> to vector<2x8x8xf32>
    %258 = vector.extract_strided_slice %204 {offsets = [0, 0, 24], sizes = [2, 8, 8], strides = [1, 1, 1]} : vector<2x8x32xf32> to vector<2x8x8xf32>
    "tpu.trace_start"() <{level = 10 : i32, message = "bqd,bkd->bqk"}> : () -> ()
    %cst_111 = arith.constant dense<0.000000e+00> : vector<2x8x8xf32>
    %259 = tpu.matmul %256, %257, %cst_111 {dimension_numbers = #tpu.dot_dimension_numbers<[2], [2], [1], [1], [0, 0, 0, 1, 1, 1], [0], [0]>} : vector<2x8x8xf32>, vector<2x8x8xf32>, vector<2x8x8xf32> -> vector<2x8x8xf32>
    "tpu.trace_stop"() : () -> ()
    %cst_112 = arith.constant 0.353553385 : f32
    %260 = vector.broadcast %cst_112 : f32 to vector<2x8x8xf32>
    %261 = arith.mulf %259, %260 : vector<2x8x8xf32>
    %cst_113 = arith.constant dense<0xFF800000> : vector<2x8xf32>
    %262 = vector.multi_reduction <maximumf>, %261, %cst_113 [2] : vector<2x8x8xf32> to vector<2x8xf32>
    %263 = vector.shape_cast %262 : vector<2x8xf32> to vector<2x8x1xf32>
    %264 = vector.broadcast %263 : vector<2x8x1xf32> to vector<2x8x8xf32>
    %265 = arith.subf %261, %264 : vector<2x8x8xf32>
    %266 = math.exp %265 : vector<2x8x8xf32>
    %cst_114 = arith.constant dense<0.000000e+00> : vector<2x8xf32>
    %267 = vector.multi_reduction <add>, %266, %cst_114 [2] : vector<2x8x8xf32> to vector<2x8xf32>
    %268 = vector.shape_cast %267 : vector<2x8xf32> to vector<2x8x1xf32>
    %269 = tpu.reciprocal %268 {approx = true} : vector<2x8x1xf32> -> vector<2x8x1xf32>
    %270 = vector.broadcast %269 : vector<2x8x1xf32> to vector<2x8x8xf32>
    %271 = arith.mulf %266, %270 : vector<2x8x8xf32>
    "tpu.trace_start"() <{level = 10 : i32, message = "bqk,bkd->bqd"}> : () -> ()
    %cst_115 = arith.constant dense<0.000000e+00> : vector<2x8x8xf32>
    %272 = tpu.matmul %271, %258, %cst_115 {dimension_numbers = #tpu.dot_dimension_numbers<[2], [1], [1], [2], [0, 0, 0, 1, 1, 2], [0], [0]>} : vector<2x8x8xf32>, vector<2x8x8xf32>, vector<2x8x8xf32> -> vector<2x8x8xf32>
    "tpu.trace_stop"() : () -> ()
    %273 = tpu.concatenate %221, %238, %255, %272 in 2 : vector<2x8x8xf32>, vector<2x8x8xf32>, vector<2x8x8xf32>, vector<2x8x8xf32> -> vector<2x8x32xf32>
    %274 = vector.shape_cast %273 : vector<2x8x32xf32> to vector<16x32xf32>
    %cst_116 = arith.constant dense<0.000000e+00> : vector<16x32xf32>
    %275 = tpu.matmul %274, %186, %cst_116 {dimension_numbers = #tpu.dot_dimension_numbers<[1], [0], [0], [1], [0, 0, 1, 1], [], []>} : vector<16x32xf32>, vector<32x32xf32>, vector<16x32xf32> -> vector<16x32xf32>
    %276 = vector.broadcast %187 : vector<1x32xf32> to vector<16x32xf32>
    %277 = arith.addf %275, %276 : vector<16x32xf32>
    %278 = arith.addf %183, %277 : vector<16x32xf32>
    %cst_117 = arith.constant dense<0.000000e+00> : vector<16xf32>
    %279 = vector.multi_reduction <add>, %278, %cst_117 [1] : vector<16x32xf32> to vector<16xf32>
    %280 = vector.shape_cast %279 : vector<16xf32> to vector<16x1xf32>
    %cst_118 = arith.constant 3.200000e+01 : f32
    %281 = vector.broadcast %cst_118 : f32 to vector<16x1xf32>
    %282 = arith.divf %280, %281 : vector<16x1xf32>
    %283 = vector.broadcast %282 : vector<16x1xf32> to vector<16x32xf32>
    %284 = arith.subf %278, %283 : vector<16x32xf32>
    %285 = arith.mulf %284, %284 : vector<16x32xf32>
    %cst_119 = arith.constant dense<0.000000e+00> : vector<16xf32>
    %286 = vector.multi_reduction <add>, %285, %cst_119 [1] : vector<16x32xf32> to vector<16xf32>
    %287 = vector.shape_cast %286 : vector<16xf32> to vector<16x1xf32>
    %cst_120 = arith.constant 3.200000e+01 : f32
    %288 = vector.broadcast %cst_120 : f32 to vector<16x1xf32>
    %289 = arith.divf %287, %288 : vector<16x1xf32>
    %290 = vector.broadcast %282 : vector<16x1xf32> to vector<16x32xf32>
    %291 = arith.subf %278, %290 : vector<16x32xf32>
    %cst_121 = arith.constant 9.99999996E-13 : f32
    %292 = vector.broadcast %cst_121 : f32 to vector<16x1xf32>
    %293 = arith.addf %289, %292 : vector<16x1xf32>
    %294 = math.rsqrt %293 : vector<16x1xf32>
    %295 = vector.broadcast %294 : vector<16x1xf32> to vector<16x32xf32>
    %296 = arith.mulf %291, %295 : vector<16x32xf32>
    %297 = vector.broadcast %188 : vector<1x32xf32> to vector<16x32xf32>
    %298 = arith.mulf %296, %297 : vector<16x32xf32>
    %299 = vector.broadcast %189 : vector<1x32xf32> to vector<16x32xf32>
    %300 = arith.addf %298, %299 : vector<16x32xf32>
    %cst_122 = arith.constant dense<0.000000e+00> : vector<16x128xf32>
    %301 = tpu.matmul %300, %190, %cst_122 {dimension_numbers = #tpu.dot_dimension_numbers<[1], [0], [0], [1], [0, 0, 1, 1], [], []>} : vector<16x32xf32>, vector<32x128xf32>, vector<16x128xf32> -> vector<16x128xf32>
    %302 = vector.broadcast %191 : vector<1x128xf32> to vector<16x128xf32>
    %303 = arith.addf %301, %302 : vector<16x128xf32>
    %cst_123 = arith.constant 5.000000e-01 : f32
    %304 = vector.broadcast %cst_123 : f32 to vector<16x128xf32>
    %305 = arith.mulf %304, %303 : vector<16x128xf32>
    %cst_124 = arith.constant 4.471500e-02 : f32
    %306 = vector.broadcast %cst_124 : f32 to vector<16x128xf32>
    %307 = arith.mulf %306, %303 : vector<16x128xf32>
    %308 = arith.mulf %307, %303 : vector<16x128xf32>
    %309 = arith.mulf %308, %303 : vector<16x128xf32>
    %310 = arith.addf %303, %309 : vector<16x128xf32>
    %cst_125 = arith.constant 0.797884583 : f32
    %311 = vector.broadcast %cst_125 : f32 to vector<16x128xf32>
    %312 = arith.mulf %311, %310 : vector<16x128xf32>
    %313 = math.tanh %312 : vector<16x128xf32>
    %cst_126 = arith.constant 1.000000e+00 : f32
    %314 = vector.broadcast %cst_126 : f32 to vector<16x128xf32>
    %315 = arith.addf %314, %313 : vector<16x128xf32>
    %316 = arith.mulf %305, %315 : vector<16x128xf32>
    %cst_127 = arith.constant dense<0.000000e+00> : vector<16x32xf32>
    %317 = tpu.matmul %316, %192, %cst_127 {dimension_numbers = #tpu.dot_dimension_numbers<[1], [0], [0], [1], [0, 0, 1, 1], [], []>} : vector<16x128xf32>, vector<128x32xf32>, vector<16x32xf32> -> vector<16x32xf32>
    %318 = vector.broadcast %193 : vector<1x32xf32> to vector<16x32xf32>
    %319 = arith.addf %317, %318 : vector<16x32xf32>
    %320 = arith.addf %300, %319 : vector<16x32xf32>
    %cst_128 = arith.constant dense<0.000000e+00> : vector<16xf32>
    %321 = vector.multi_reduction <add>, %320, %cst_128 [1] : vector<16x32xf32> to vector<16xf32>
    %322 = vector.shape_cast %321 : vector<16xf32> to vector<16x1xf32>
    %cst_129 = arith.constant 3.200000e+01 : f32
    %323 = vector.broadcast %cst_129 : f32 to vector<16x1xf32>
    %324 = arith.divf %322, %323 : vector<16x1xf32>
    %325 = vector.broadcast %324 : vector<16x1xf32> to vector<16x32xf32>
    %326 = arith.subf %320, %325 : vector<16x32xf32>
    %327 = arith.mulf %326, %326 : vector<16x32xf32>
    %cst_130 = arith.constant dense<0.000000e+00> : vector<16xf32>
    %328 = vector.multi_reduction <add>, %327, %cst_130 [1] : vector<16x32xf32> to vector<16xf32>
    %329 = vector.shape_cast %328 : vector<16xf32> to vector<16x1xf32>
    %cst_131 = arith.constant 3.200000e+01 : f32
    %330 = vector.broadcast %cst_131 : f32 to vector<16x1xf32>
    %331 = arith.divf %329, %330 : vector<16x1xf32>
    %332 = vector.broadcast %324 : vector<16x1xf32> to vector<16x32xf32>
    %333 = arith.subf %320, %332 : vector<16x32xf32>
    %cst_132 = arith.constant 9.99999996E-13 : f32
    %334 = vector.broadcast %cst_132 : f32 to vector<16x1xf32>
    %335 = arith.addf %331, %334 : vector<16x1xf32>
    %336 = math.rsqrt %335 : vector<16x1xf32>
    %337 = vector.broadcast %336 : vector<16x1xf32> to vector<16x32xf32>
    %338 = arith.mulf %333, %337 : vector<16x32xf32>
    %339 = vector.broadcast %194 : vector<1x32xf32> to vector<16x32xf32>
    %340 = arith.mulf %338, %339 : vector<16x32xf32>
    %341 = vector.broadcast %195 : vector<1x32xf32> to vector<16x32xf32>
    %342 = arith.addf %340, %341 : vector<16x32xf32>
    %343 = arith.addf %183, %342 : vector<16x32xf32>
    %c0_133 = arith.constant 0 : index
    %c0_134 = arith.constant 0 : index
    %344 = vector.load %arg27[%c0_133, %c0_134] : memref<16x32xf32, #tpu.memory_space<vmem>>, vector<16x32xf32>
    tpu.vector_store %arg27[%c0_133, %c0_134], %343 {strides = array<i32>} : memref<16x32xf32, #tpu.memory_space<vmem>>, vector<16x32xf32>,
    return
  }
}

</mosaic_0001>

<bundles_post_ra>
// kernel: bert_mid_layer_forward.1
= control target key start
LH: loop header
LB: loop body
LE: loop exit
PB: predicated region body
PF: predicated region fallthrough
CT: control target
= control target key end

     0   :  { %s5262_s0 = inlined_call_operand.vmem [shape: f32[16,32], index: 0, kind: input, shape index: {}]   ;;  %s5263_s1 = inlined_call_operand.vmem [shape: f32[1,32], index: 1, kind: input, shape index: {}]   ;;  %s5264_s2 = inlined_call_operand.vmem [shape: f32[1,32], index: 2, kind: input, shape index: {}]   ;;  %s5265_s3 = inlined_call_operand.vmem [shape: f32[32,96], index: 3, kind: input, shape index: {}]   ;;  %s5266_s4 = inlined_call_operand.vmem [shape: f32[1,96], index: 4, kind: input, shape index: {}]   ;;  %s5267_s5 = inlined_call_operand.vmem [shape: f32[32,32], index: 5, kind: input, shape index: {}]   ;;  %s5268_s6 = inlined_call_operand.vmem [shape: f32[1,32], index: 6, kind: input, shape index: {}]   ;;  %s5269_s7 = inlined_call_operand.vmem [shape: f32[1,32], index: 7, kind: input, shape index: {}]   ;;  %s5270_s8 = inlined_call_operand.vmem [shape: f32[1,32], index: 8, kind: input, shape index: {}]   ;;  %s5271_s9 = inlined_call_operand.vmem [shape: f32[32,128], index: 9, kind: input, shape index: {}]   ;;  %s5272_s10 = inlined_call_operand.vmem [shape: f32[1,128], index: 10, kind: input, shape index: {}]   ;;  %s5273_s11 = inlined_call_operand.vmem [shape: f32[128,32], index: 11, kind: input, shape index: {}]   ;;  %s5274_s12 = inlined_call_operand.vmem [shape: f32[1,32], index: 12, kind: input, shape index: {}]   ;;  %s5275_s13 = inlined_call_operand.vmem [shape: f32[1,32], index: 13, kind: input, shape index: {}]   ;;  %s5276_s14 = inlined_call_operand.vmem [shape: f32[1,32], index: 14, kind: input, shape index: {}]   ;;  %s5277_s15 = inlined_call_operand.vmem [shape: f32[32,96], index: 15, kind: input, shape index: {}]   ;;  %s5278_s16 = inlined_call_operand.vmem [shape: f32[1,96], index: 16, kind: input, shape index: {}]   ;;  %s5279_s17 = inlined_call_operand.vmem [shape: f32[32,32], index: 17, kind: input, shape index: {}]   ;;  %s5280_s18 = inlined_call_operand.vmem [shape: f32[1,32], index: 18, kind: input, shape index: {}]   ;;  %s5281_s19 = inlined_call_operand.vmem [shape: f32[1,32], index: 19, kind: input, shape index: {}]   ;;  %s5282_s20 = inlined_call_operand.vmem [shape: f32[1,32], index: 20, kind: input, shape index: {}]   ;;  %s5283_s21 = inlined_call_operand.vmem [shape: f32[32,128], index: 21, kind: input, shape index: {}]   ;;  %s5284_s22 = inlined_call_operand.vmem [shape: f32[1,128], index: 22, kind: input, shape index: {}]   ;;  %s5285_s23 = inlined_call_operand.vmem [shape: f32[128,32], index: 23, kind: input, shape index: {}]   ;;  %s5286_s24 = inlined_call_operand.vmem [shape: f32[1,32], index: 24, kind: input, shape index: {}]   ;;  %s5287_s25 = inlined_call_operand.vmem [shape: f32[1,32], index: 25, kind: input, shape index: {}]   ;;  %s5288_s26 = inlined_call_operand.vmem [shape: f32[1,32], index: 26, kind: input, shape index: {}]   ;;  %s5289_s27 = inlined_call_operand.hbm [shape: f32[16,32], index: 27, kind: output, shape index: {}]  }
   0x1   :  { %5311 = sst [smem:[#allocation5_spill]] %s5262_s0 }
   0x2   :  { %5312 = sst [smem:[#allocation6_spill]] %s5263_s1 }
   0x3   :  { %5313 = sst [smem:[#allocation7_spill]] %s5264_s2 }
   0x4   :  { %5314 = sst [smem:[#allocation8_spill]] %s5265_s3 }
   0x5   :  { %5315 = sst [smem:[#allocation9_spill]] %s5266_s4 }
   0x6   :  { %5316 = sst [smem:[#allocation10_spill]] %s5267_s5 }
   0x7   :  { %5317 = sst [smem:[#allocation11_spill]] %s5268_s6 }
   0x8   :  { %5318 = sst [smem:[#allocation12_spill]] %s5269_s7 }
   0x9   :  { %5319 = sst [smem:[#allocation13_spill]] %s5270_s8 }
   0xa   :  { %5320 = sst [smem:[#allocation14_spill]] %s5271_s9 }
   0xb   :  { %5321 = sst [smem:[#allocation15_spill]] %s5272_s10 }
   0xc   :  { %5322 = sst [smem:[#allocation16_spill]] %s5273_s11 }
   0xd   :  { %s5323_s8 = sld [smem:[#allocation5_spill]]  ;;  %vm91_vm0 = vcmask 261120  }
  0x13   :  { %v87_v0 = vld [vmem:[%s5323_s8] sm:$0xff]  ;;  %v88_v1 = vld [vmem:[%s5323_s8 + $0x8] sm:$0xff] }
  0x14   :  { %32 = vsyncpa [#allocation3], 0  ;;  %v92_v2 = vsel %vm91_vm0, %v87_v0, 0.0  ;;  %v95_v3 = vsel %vm91_vm0, %v88_v1, 0.0  ;;  %s5324_s0 = sld [smem:[#allocation8_spill]]  ;;  %v4480_v34 = vmov 0.0  }
  0x15   :  { %93 = vadd.xlane.f32.xlu0 %v92_v2  ;;  %s5325_s4 = sld [smem:[#allocation6_spill]]  ;;  %4073 = vmatprep.subr.mxu0 %v4480_v34  ;;  %vm4481_vm1 = vmmov 0   ;;  %s4482_s10 = smov 96   ;;  %vm261_vm2 = vcmask 64512   ;;  %vm1614_vm3 = vcmask 195584   ;;  %vm1611_vm4 = vcmask 130048  }
  0x16   :  { %s5326_s9 = sld [smem:[#allocation7_spill]]  ;;  %4075 = vmatprep.mubr.msk.f32.mxu0 %vm4481_vm1, %v4480_v34  ;;  %s4483_s29 = smov 64  }
  0x17   :  { %s4484_s1 = smov 88   ;;  %s4485_s6 = smov 120  }
  0x18   :  { %s4486_s11 = smov 56   ;;  %s4487_s2 = smov 80  }
  0x19   :  { %96 = vadd.xlane.f32.xlu0 %v95_v3  ;;  %s5307_s3 = smov 112   ;;  %s5305_s7 = smov 48  }
  0x1a   :  { %v138_v14 = vld [vmem:[%s5324_s0 + $0x18] sm:$0xff]  ;;  %v137_v15 = vld [vmem:[%s5324_s0 + $0x10] sm:$0xff]  ;;  %v136_v16 = vld [vmem:[%s5324_s0 + $0x8] sm:$0xff]  ;;  %s5301_s8 = smov 104   ;;  %s5299_s30 = smov 40  }
  0x1b   :  { %4052 = vmatprep.subr.mxu1 %v138_v14  ;;  %v135_v17 = vld [vmem:[%s5324_s0] sm:$0xff]  ;;  %s5327_s0 = sld [smem:[#allocation9_spill]]  ;;  %s5297_s5 = smov 16  }
  0x1c   :  { %4053 = vmatpush3.msra.mxu1 %v138_v14  ;;  %v3838_v25 = vld [vmem:[%s5325_s4] ss:$0 sm:$0xff]  ;;  %s5303_s4 = smov 72   ;;  %s5309_s28 = smov 24  }
  0x1d   :  { %4054 = vmatprep.subr.mxu1 %v137_v15  ;;  %v3839_v27 = vld [vmem:[%s5326_s9] ss:$0 sm:$0xff]  ;;  %s5295_s9 = smov 8  }
  0x1e   :  { %4055 = vmatpush3.msra.mxu1 %v137_v15 }
  0x1f   :  { %4056 = vmatprep.subr.mxu1 %v136_v16 }
  0x20   :  { %4057 = vmatpush3.msra.mxu1 %v136_v16 }
  0x21   :  { %4058 = vmatprep.subr.mxu1 %v135_v17  ;;  %v3840_v35 = vld [vmem:[%s5327_s0] ss:$0 sm:$0xff] }
  0x22   :  { %4059 = vmatpush3.msra.mxu1 %v135_v17 }
  0x23   :  { %4063 = vmatprep.subr.mxu1 %v4480_v34 }
  0x9e   :  { %v94_v4 = vpop.xlane.xlu0 %93 }
  0x9f   :  { %v99_v5 = vmul.f32 0.03125, %v94_v4 }
  0xa1   :  { %v101_v6 = vsub.f32 %v87_v0, %v99_v5 }
  0xa2   :  { %v97_v7 = vpop.xlane.xlu0 %96 }
  0xa3   :  { %v100_v8 = vmul.f32 0.03125, %v97_v7  ;;  %v103_v9 = vmul.f32 %v101_v6, %v101_v6 }
  0xa5   :  { %v102_v10 = vsub.f32 %v88_v1, %v100_v8  ;;  %v105_v11 = vsel %vm91_vm0, %v103_v9, 0.0 }
  0xa6   :  { %106 = vadd.xlane.f32.xlu1 %v105_v11 }
  0xa7   :  { %v104_v12 = vmul.f32 %v102_v10, %v102_v10 }
  0xa9   :  { %v108_v13 = vsel %vm91_vm0, %v104_v12, 0.0 }
  0xaa   :  { %109 = vadd.xlane.f32.xlu1 %v108_v13 }
 0x12f   :  { %v107_v18 = vpop.xlane.xlu1 %106 }
 0x130   :  { %v111_v19 = vmul.f32 0.03125, %v107_v18 }
 0x132   :  { %v113_v20 = vadd.f32 1e-12, %v111_v19 }
 0x133   :  { %v110_v21 = vpop.xlane.xlu1 %109 }
 0x134   :  { %4366 = vrsqrt.f32 %v113_v20  ;;  %v112_v22 = vmul.f32 0.03125, %v110_v21 }
 0x136   :  { %v114_v23 = vadd.f32 1e-12, %v112_v22 }
 0x138   :  { %4368 = vrsqrt.f32 %v114_v23 }
 0x141   :  { %v4367_v24 = vpop.eup %4366 }
 0x142   :  { %v117_v26 = vmul.f32 %v4367_v24, %v101_v6 }
 0x144   :  { %v125_v28 = vmul.f32 %v3838_v25, %v117_v26 }
 0x145   :  { %v4369_v29 = vpop.eup %4368 }
 0x146   :  { %v118_v30 = vmul.f32 %v4369_v29, %v102_v10  ;;  %v4666_v31 = vadd.f32 %v3839_v27, %v125_v28 }
 0x148   :  { %v126_v32 = vmul.f32 %v3838_v25, %v118_v30  ;;  %4060 = vmatprep.mubr.msk.f32.mxu1 %vm91_vm0, %v4666_v31 }
 0x14a   :  { %v4670_v33 = vadd.f32 %v3839_v27, %v126_v32 }
 0x14c   :  { %4061 = vmatmul.mubr.msk.f32.vlgmr.msra.gmra.mxu1 %vm91_vm0, %v4670_v33 }
 0x14d   :  { %4065 = vmatprep.mubr.msk.f32.mxu1 %vm4481_vm1, %v4480_v34 }
 0x20c   :  { %v4062_v36 = vpop.f32.mrf.mxu1 }
 0x20d   :  { %v4683_v37 = vadd.f32 %v4062_v36, %v3840_v35 }
 0x20e   :  { %v249_v38 = vpop.f32.mrf.mxu1 }
 0x20f   :  { %v4685_v39 = vadd.f32 %v3840_v35, %v249_v38  ;;  %337 = vrot.lane.b32.xlu1 %v4683_v37, %s4482_s10 }
 0x211   :  { %259 = vrot.lane.b32.xlu0 %v4685_v39, %s4482_s10 }
 0x281   :  { %v338_v41 = vpop.permute.xlu1 %337 }
 0x283   :  { %v260_v40 = vpop.permute.xlu0 %259 }
 0x284   :  { %4064 = vmatpush3.xpose.msk.msra.mxu1 %vm261_vm2, %v260_v40 }
 0x285   :  { %4068 = vmatprep.subr.mxu1 %v4480_v34 }
 0x287   :  { %4066 = vmatmul.mubr.msk.f32.vlgmr.msra.gmra.mxu1 %vm261_vm2, %v4685_v39 }
 0x288   :  { %4069 = vmatpush3.xpose.msk.msra.mxu1 %vm261_vm2, %v338_v41  ;;  %4070 = vmatprep.mubr.msk.f32.mxu1 %vm4481_vm1, %v4480_v34 }
 0x289   :  { %4078 = vmatprep.subr.mxu1 %v4480_v34 }
 0x28b   :  { %4071 = vmatmul.mubr.msk.f32.vlgmr.msra.gmra.mxu1 %vm261_vm2, %v4683_v37 }
 0x28c   :  { %4080 = vmatprep.mubr.msk.f32.mxu1 %vm4481_vm1, %v4480_v34 }
 0x347   :  { %v332_v42 = vpop.f32.mrf.mxu1 }
 0x348   :  { %v413_v43 = vmul.f32 0.35355338, %v332_v42 }
 0x349   :  { %v4067_v44 = vpop.f32.mrf.mxu1 }
 0x34a   :  { %v415_v45 = vsel %vm261_vm2, %v413_v43, -inf }
 0x34b   :  { %416 = vmax.xlane.f32.xlu1 %v415_v45  ;;  %v409_v46 = vpop.f32.mrf.mxu1 }
 0x34c   :  { %v414_v47 = vmul.f32 0.35355338, %v409_v46 }
 0x34d   :  { %v4072_v48 = vpop.f32.mrf.mxu1 }
 0x34e   :  { %v418_v49 = vsel %vm261_vm2, %v414_v47, -inf }
 0x34f   :  { %419 = vmax.xlane.f32.xlu0 %v418_v49 }
 0x35c   :  { %513 = vrot.lane.b32.xlu1 %v4683_v37, %s4483_s29 }
 0x360   :  { %591 = vrot.lane.b32.xlu1 %v4685_v39, %s4484_s1 }
 0x364   :  { %669 = vrot.lane.b32.xlu1 %v4683_v37, %s4484_s1 }
 0x3d4   :  { %v417_v50 = vpop.xlane.xlu1 %416 }
 0x3d5   :  { %v421_v51 = vsub.f32 %v413_v43, %v417_v50 }
 0x3d7   :  { %v423_v52 = vmul.f32 1.442695, %v421_v51 }
 0x3d8   :  { %v514_v53 = vpop.permute.xlu1 %513  ;;  %v420_v54 = vpop.xlane.xlu0 %419 }
 0x3d9   :  { %4370 = vpow2.f32 %v423_v52  ;;  %v422_v55 = vsub.f32 %v414_v47, %v420_v54  ;;  %4079 = vmatpush3.msra.mxu1 %v514_v53 }
 0x3da   :  { %4088 = vmatprep.subr.mxu1 %v4480_v34 }
 0x3db   :  { %v425_v56 = vmul.f32 1.442695, %v422_v55 }
 0x3dc   :  { %v592_v61 = vpop.permute.xlu1 %591 }
 0x3dd   :  { %4372 = vpow2.f32 %v425_v56 }
 0x3e0   :  { %v670_v62 = vpop.permute.xlu1 %669 }
 0x3e6   :  { %v4371_v57 = vpop.eup %4370 }
 0x3e7   :  { %v427_v58 = vsel %vm261_vm2, %v4371_v57, 0.0 }
 0x3e8   :  { %428 = vadd.xlane.f32.xlu0 %v427_v58 }
 0x3ea   :  { %v4373_v59 = vpop.eup %4372 }
 0x3eb   :  { %v430_v60 = vsel %vm261_vm2, %v4373_v59, 0.0 }
 0x3ec   :  { %431 = vadd.xlane.f32.xlu1 %v430_v60 }
 0x3fd   :  { %667 = vrot.lane.b32.xlu1 %v4683_v37, %s4485_s6 }
 0x3fe   :  { %437 = vrot.lane.b32.xlu0 %v4685_v39, %s4483_s29 }
 0x402   :  { %589 = vrot.lane.b32.xlu0 %v4685_v39, %s4485_s6 }
 0x471   :  { %v429_v63 = vpop.xlane.xlu0 %428 }
 0x472   :  { %4374 = vrcp.f32 %v429_v63 }
 0x475   :  { %v432_v0 = vpop.xlane.xlu1 %431  ;;  %v438_v1 = vpop.permute.xlu0 %437 }
 0x476   :  { %4376 = vrcp.f32 %v432_v0  ;;  %4074 = vmatpush3.msra.mxu0 %v438_v1 }
 0x477   :  { %4083 = vmatprep.subr.mxu0 %v4480_v34 }
 0x479   :  { %v590_v6 = vpop.permute.xlu0 %589  ;;  %v668_v7 = vpop.permute.xlu1 %667 }
 0x47f   :  { %v4375_v2 = vpop.eup %4374 }
 0x480   :  { %v435_v3 = vmul.f32 %v4375_v2, %v4371_v57 }
 0x482   :  { %4076 = vmatmul.mubr.msk.f32.vlgmr.msra.gmra.mxu0 %vm261_vm2, %v435_v3 }
 0x483   :  { %v4377_v4 = vpop.eup %4376  ;;  %4084 = vmatpush3.xpose.msk.msra.mxu0 %vm261_vm2, %v592_v61  ;;  %4085 = vmatprep.mubr.msk.f32.mxu0 %vm4481_vm1, %v4480_v34 }
 0x484   :  { %v436_v5 = vmul.f32 %v4377_v4, %v4373_v59  ;;  %4093 = vmatprep.subr.mxu0 %v4480_v34 }
 0x486   :  { %4081 = vmatmul.mubr.msk.f32.vlgmr.msra.gmra.mxu1 %vm261_vm2, %v436_v5  ;;  %4086 = vmatmul.mubr.msk.f32.vlgmr.msra.gmra.mxu0 %vm261_vm2, %v590_v6 }
 0x487   :  { %4089 = vmatpush3.xpose.msk.msra.mxu1 %vm261_vm2, %v670_v62  ;;  %4090 = vmatprep.mubr.msk.f32.mxu1 %vm4481_vm1, %v4480_v34 }
 0x488   :  { %4098 = vmatprep.subr.mxu1 %v4480_v34  ;;  %4095 = vmatprep.mubr.msk.f32.mxu0 %vm4481_vm1, %v4480_v34 }
 0x48a   :  { %4091 = vmatmul.mubr.msk.f32.vlgmr.msra.gmra.mxu1 %vm261_vm2, %v668_v7 }
 0x48b   :  { %4100 = vmatprep.mubr.msk.f32.mxu1 %vm4481_vm1, %v4480_v34 }
 0x542   :  { %v4737_v8 = vpop.f32.mrf.mxu0 }
 0x544   :  { %v4077_v9 = vpop.f32.mrf.mxu0 }
 0x546   :  { %v4739_v10 = vpop.f32.mrf.mxu1  ;;  %v663_v11 = vpop.f32.mrf.mxu0 }
 0x547   :  { %v745_v12 = vmul.f32 0.35355338, %v663_v11 }
 0x548   :  { %v4082_v13 = vpop.f32.mrf.mxu1  ;;  %v4087_v14 = vpop.f32.mrf.mxu0 }
 0x549   :  { %v747_v15 = vsel %vm261_vm2, %v745_v12, -inf }
 0x54a   :  { %748 = vmax.xlane.f32.xlu0 %v747_v15  ;;  %v741_v16 = vpop.f32.mrf.mxu1 }
 0x54b   :  { %v746_v17 = vmul.f32 0.35355338, %v741_v16 }
 0x54c   :  { %v4092_v18 = vpop.f32.mrf.mxu1 }
 0x54d   :  { %v750_v19 = vsel %vm261_vm2, %v746_v17, -inf }
 0x54e   :  { %751 = vmax.xlane.f32.xlu1 %v750_v19 }
 0x55f   :  { %845 = vrot.lane.b32.xlu1 %v4683_v37, %s4486_s11 }
 0x560   :  { %769 = vrot.lane.b32.xlu0 %v4685_v39, %s4486_s11 }
 0x563   :  { %923 = vrot.lane.b32.xlu1 %v4685_v39, %s4487_s2 }
 0x567   :  { %1001 = vrot.lane.b32.xlu1 %v4683_v37, %s4487_s2 }
 0x56b   :  { %999 = vrot.lane.b32.xlu1 %v4683_v37, %s5307_s3 }
 0x5d3   :  { %v749_v20 = vpop.xlane.xlu0 %748 }
 0x5d4   :  { %v753_v21 = vsub.f32 %v745_v12, %v749_v20 }
 0x5d6   :  { %v755_v22 = vmul.f32 1.442695, %v753_v21 }
 0x5d7   :  { %v770_v23 = vpop.permute.xlu0 %769  ;;  %v752_v24 = vpop.xlane.xlu1 %751 }
 0x5d8   :  { %4378 = vpow2.f32 %v755_v22  ;;  %v754_v25 = vsub.f32 %v746_v17, %v752_v24  ;;  %4094 = vmatpush3.msra.mxu0 %v770_v23 }
 0x5d9   :  { %4103 = vmatprep.subr.mxu0 %v4480_v34 }
 0x5da   :  { %v757_v26 = vmul.f32 1.442695, %v754_v25 }
 0x5db   :  { %v846_v27 = vpop.permute.xlu1 %845 }
 0x5dc   :  { %4380 = vpow2.f32 %v757_v26  ;;  %4099 = vmatpush3.msra.mxu1 %v846_v27 }
 0x5dd   :  { %4108 = vmatprep.subr.mxu1 %v4480_v34 }
 0x5df   :  { %v924_v38 = vpop.permute.xlu1 %923 }
 0x5e3   :  { %v1002_v43 = vpop.permute.xlu1 %1001 }
 0x5e5   :  { %v4379_v28 = vpop.eup %4378 }
 0x5e6   :  { %v759_v29 = vsel %vm261_vm2, %v4379_v28, 0.0 }
 0x5e7   :  { %760 = vadd.xlane.f32.xlu0 %v759_v29  ;;  %v1000_v46 = vpop.permute.xlu1 %999 }
 0x5e9   :  { %v4381_v30 = vpop.eup %4380 }
 0x5ea   :  { %v762_v32 = vsel %vm261_vm2, %v4381_v30, 0.0 }
 0x5eb   :  { %763 = vadd.xlane.f32.xlu0 %v762_v32 }
 0x601   :  { %921 = vrot.lane.b32.xlu0 %v4685_v39, %s5307_s3 }
 0x670   :  { %v761_v35 = vpop.xlane.xlu0 %760 }
 0x671   :  { %4382 = vrcp.f32 %v761_v35 }
 0x674   :  { %v764_v36 = vpop.xlane.xlu0 %763 }
 0x675   :  { %4384 = vrcp.f32 %v764_v36 }
 0x678   :  { %v922_v45 = vpop.permute.xlu0 %921 }
 0x67e   :  { %v4383_v40 = vpop.eup %4382 }
 0x67f   :  { %v767_v41 = vmul.f32 %v4383_v40, %v4379_v28 }
 0x681   :  { %4096 = vmatmul.mubr.msk.f32.vlgmr.msra.gmra.mxu0 %vm261_vm2, %v767_v41 }
 0x682   :  { %v4385_v42 = vpop.eup %4384  ;;  %4104 = vmatpush3.xpose.msk.msra.mxu0 %vm261_vm2, %v924_v38  ;;  %4105 = vmatprep.mubr.msk.f32.mxu0 %vm4481_vm1, %v4480_v34 }
 0x683   :  { %v768_v44 = vmul.f32 %v4385_v42, %v4381_v30  ;;  %4113 = vmatprep.subr.mxu0 %v4480_v34 }
 0x685   :  { %4101 = vmatmul.mubr.msk.f32.vlgmr.msra.gmra.mxu1 %vm261_vm2, %v768_v44  ;;  %4106 = vmatmul.mubr.msk.f32.vlgmr.msra.gmra.mxu0 %vm261_vm2, %v922_v45 }
 0x686   :  { %4109 = vmatpush3.xpose.msk.msra.mxu1 %vm261_vm2, %v1002_v43  ;;  %4110 = vmatprep.mubr.msk.f32.mxu1 %vm4481_vm1, %v4480_v34 }
 0x687   :  { %4118 = vmatprep.subr.mxu1 %v4480_v34  ;;  %4115 = vmatprep.mubr.msk.f32.mxu0 %vm4481_vm1, %v4480_v34 }
 0x689   :  { %4111 = vmatmul.mubr.msk.f32.vlgmr.msra.gmra.mxu1 %vm261_vm2, %v1000_v46 }
 0x68a   :  { %4120 = vmatprep.mubr.msk.f32.mxu1 %vm4481_vm1, %v4480_v34 }
 0x741   :  { %v4775_v47 = vpop.f32.mrf.mxu0 }
 0x743   :  { %v4097_v48 = vpop.f32.mrf.mxu0 }
 0x745   :  { %v4777_v49 = vpop.f32.mrf.mxu1  ;;  %v995_v50 = vpop.f32.mrf.mxu0 }
 0x746   :  { %v1077_v51 = vmul.f32 0.35355338, %v995_v50 }
 0x747   :  { %v4102_v52 = vpop.f32.mrf.mxu1  ;;  %v4107_v53 = vpop.f32.mrf.mxu0 }
 0x748   :  { %v1079_v54 = vsel %vm261_vm2, %v1077_v51, -inf }
 0x749   :  { %1080 = vmax.xlane.f32.xlu0 %v1079_v54  ;;  %v1073_v55 = vpop.f32.mrf.mxu1 }
 0x74a   :  { %v1078_v56 = vmul.f32 0.35355338, %v1073_v55 }
 0x74b   :  { %v4112_v57 = vpop.f32.mrf.mxu1 }
 0x74c   :  { %v1082_v58 = vsel %vm261_vm2, %v1078_v56, -inf }
 0x74d   :  { %1083 = vmax.xlane.f32.xlu1 %v1082_v58 }
 0x75e   :  { %1177 = vrot.lane.b32.xlu1 %v4683_v37, %s5305_s7 }
 0x75f   :  { %1101 = vrot.lane.b32.xlu0 %v4685_v39, %s5305_s7 }
 0x762   :  { %1255 = vrot.lane.b32.xlu1 %v4685_v39, %s5303_s4 }
 0x766   :  { %1333 = vrot.lane.b32.xlu1 %v4683_v37, %s5303_s4  ;;  %s5329_s4 = sld [smem:[#allocation11_spill]] }
 0x76a   :  { %1331 = vrot.lane.b32.xlu1 %v4683_v37, %s5301_s8 }
 0x7d2   :  { %v1081_v59 = vpop.xlane.xlu0 %1080 }
 0x7d3   :  { %v1085_v60 = vsub.f32 %v1077_v51, %v1081_v59 }
 0x7d5   :  { %v1087_v61 = vmul.f32 1.442695, %v1085_v60 }
 0x7d6   :  { %v1102_v62 = vpop.permute.xlu0 %1101  ;;  %v1084_v63 = vpop.xlane.xlu1 %1083 }
 0x7d7   :  { %4386 = vpow2.f32 %v1087_v61  ;;  %v1086_v0 = vsub.f32 %v1078_v56, %v1084_v63  ;;  %4114 = vmatpush3.msra.mxu0 %v1102_v62 }
 0x7d8   :  { %4123 = vmatprep.subr.mxu0 %v4480_v34 }
 0x7d9   :  { %v1089_v1 = vmul.f32 1.442695, %v1086_v0 }
 0x7da   :  { %v1178_v2 = vpop.permute.xlu1 %1177 }
 0x7db   :  { %4388 = vpow2.f32 %v1089_v1  ;;  %4119 = vmatpush3.msra.mxu1 %v1178_v2 }
 0x7dc   :  { %4128 = vmatprep.subr.mxu1 %v4480_v34 }
 0x7de   :  { %v1256_v11 = vpop.permute.xlu1 %1255 }
 0x7e2   :  { %v1334_v15 = vpop.permute.xlu1 %1333 }
 0x7e4   :  { %v4387_v3 = vpop.eup %4386 }
 0x7e5   :  { %v1091_v4 = vsel %vm261_vm2, %v4387_v3, 0.0 }
 0x7e6   :  { %1092 = vadd.xlane.f32.xlu0 %v1091_v4  ;;  %v1332_v18 = vpop.permute.xlu1 %1331 }
 0x7e8   :  { %v4389_v5 = vpop.eup %4388 }
 0x7e9   :  { %v1094_v6 = vsel %vm261_vm2, %v4389_v5, 0.0 }
 0x7ea   :  { %1095 = vadd.xlane.f32.xlu0 %v1094_v6 }
 0x800   :  { %1253 = vrot.lane.b32.xlu0 %v4685_v39, %s5301_s8  ;;  %s5334_s8 = sld [smem:[#allocation15_spill]] }
 0x86f   :  { %v1093_v7 = vpop.xlane.xlu0 %1092 }
 0x870   :  { %4390 = vrcp.f32 %v1093_v7 }
 0x873   :  { %v1096_v9 = vpop.xlane.xlu0 %1095 }
 0x874   :  { %4392 = vrcp.f32 %v1096_v9 }
 0x877   :  { %v1254_v17 = vpop.permute.xlu0 %1253 }
 0x87d   :  { %v4391_v12 = vpop.eup %4390 }
 0x87e   :  { %v1099_v13 = vmul.f32 %v4391_v12, %v4387_v3 }
 0x880   :  { %4116 = vmatmul.mubr.msk.f32.vlgmr.msra.gmra.mxu0 %vm261_vm2, %v1099_v13 }
 0x881   :  { %v4393_v14 = vpop.eup %4392  ;;  %4124 = vmatpush3.xpose.msk.msra.mxu0 %vm261_vm2, %v1256_v11  ;;  %4125 = vmatprep.mubr.msk.f32.mxu0 %vm4481_vm1, %v4480_v34 }
 0x882   :  { %v1100_v16 = vmul.f32 %v4393_v14, %v4389_v5  ;;  %4133 = vmatprep.subr.mxu0 %v4480_v34 }
 0x884   :  { %4121 = vmatmul.mubr.msk.f32.vlgmr.msra.gmra.mxu1 %vm261_vm2, %v1100_v16  ;;  %4126 = vmatmul.mubr.msk.f32.vlgmr.msra.gmra.mxu0 %vm261_vm2, %v1254_v17 }
 0x885   :  { %4129 = vmatpush3.xpose.msk.msra.mxu1 %vm261_vm2, %v1334_v15  ;;  %4130 = vmatprep.mubr.msk.f32.mxu1 %vm4481_vm1, %v4480_v34 }
 0x886   :  { %4138 = vmatprep.subr.mxu1 %v4480_v34  ;;  %4135 = vmatprep.mubr.msk.f32.mxu0 %vm4481_vm1, %v4480_v34 }
 0x888   :  { %4131 = vmatmul.mubr.msk.f32.vlgmr.msra.gmra.mxu1 %vm261_vm2, %v1332_v18 }
 0x889   :  { %4140 = vmatprep.mubr.msk.f32.mxu1 %vm4481_vm1, %v4480_v34 }
 0x940   :  { %v1173_v19 = vpop.f32.mrf.mxu0 }
 0x942   :  { %v4117_v20 = vpop.f32.mrf.mxu0 }
 0x944   :  { %v1249_v21 = vpop.f32.mrf.mxu1  ;;  %v1327_v22 = vpop.f32.mrf.mxu0 }
 0x945   :  { %v1409_v23 = vmul.f32 0.35355338, %v1327_v22 }
 0x946   :  { %v4122_v24 = vpop.f32.mrf.mxu1  ;;  %v4127_v25 = vpop.f32.mrf.mxu0 }
 0x947   :  { %v1411_v26 = vsel %vm261_vm2, %v1409_v23, -inf }
 0x948   :  { %1412 = vmax.xlane.f32.xlu0 %v1411_v26  ;;  %v1405_v27 = vpop.f32.mrf.mxu1 }
 0x949   :  { %v1410_v28 = vmul.f32 0.35355338, %v1405_v27 }
 0x94a   :  { %v4132_v29 = vpop.f32.mrf.mxu1 }
 0x94b   :  { %v1414_v30 = vsel %vm261_vm2, %v1410_v28, -inf }
 0x94c   :  { %1415 = vmax.xlane.f32.xlu1 %v1414_v30 }
 0x95d   :  { %1509 = vrot.lane.b32.xlu1 %v4683_v37, %s5299_s30 }
 0x961   :  { %1587 = vrot.lane.b32.xlu1 %v4775_v47, %s5295_s9 }
 0x965   :  { %1589 = vrot.lane.b32.xlu1 %v4777_v49, %s5295_s9  ;;  %s5328_s9 = sld [smem:[#allocation10_spill]] }
 0x969   :  { %1597 = vrot.lane.b32.xlu1 %v1249_v21, %s5297_s5 }
 0x96b   :  { %v142_v53 = vld [vmem:[%s5328_s9 + $0x10] sm:$0xff]  ;;  %v141_v54 = vld [vmem:[%s5328_s9 + $0x8] sm:$0xff]  ;;  %v140_v55 = vld [vmem:[%s5328_s9] sm:$0xff] }
 0x9d1   :  { %v1413_v32 = vpop.xlane.xlu0 %1412 }
 0x9d2   :  { %v1417_v35 = vsub.f32 %v1409_v23, %v1413_v32 }
 0x9d4   :  { %v1419_v36 = vmul.f32 1.442695, %v1417_v35 }
 0x9d5   :  { %v1416_v38 = vpop.xlane.xlu1 %1415 }
 0x9d6   :  { %4394 = vpow2.f32 %v1419_v36  ;;  %v1418_v40 = vsub.f32 %v1410_v28, %v1416_v38 }
 0x9d8   :  { %v1421_v41 = vmul.f32 1.442695, %v1418_v40 }
 0x9d9   :  { %v1510_v42 = vpop.permute.xlu1 %1509 }
 0x9da   :  { %4396 = vpow2.f32 %v1421_v41  ;;  %4139 = vmatpush3.msra.mxu1 %v1510_v42 }
 0x9dd   :  { %v1588_v60 = vpop.permute.xlu1 %1587 }
 0x9de   :  { %v1609_v63 = vsel %vm261_vm2, %v4737_v8, %v1588_v60  ;;  %v3867_v8 = vld [vmem:[%s5329_s4] ss:$0 sm:$0xff]  ;;  %s5333_s4 = sld [smem:[#allocation16_spill]] }
 0x9e1   :  { %v1590_v61 = vpop.permute.xlu1 %1589 }
 0x9e2   :  { %v1610_v4 = vsel %vm261_vm2, %v4739_v10, %v1590_v61 }
 0x9e3   :  { %v4395_v37 = vpop.eup %4394 }
 0x9e4   :  { %v1423_v43 = vsel %vm261_vm2, %v4395_v37, 0.0  ;;  %v155_v60 = vld [vmem:[%s5333_s4 + $0x18] sm:$0xff]  ;;  %v154_v61 = vld [vmem:[%s5333_s4 + $0x10] sm:$0xff] }
 0x9e5   :  { %1424 = vadd.xlane.f32.xlu0 %v1423_v43  ;;  %v1598_v0 = vpop.permute.xlu1 %1597 }
 0x9e6   :  { %v1613_v5 = vsel %vm1611_vm4, %v1610_v4, %v1598_v0  ;;  %v3872_v0 = vld [vmem:[%s5334_s8] ss:$0 sm:$0xff] }
 0x9e7   :  { %v4397_v44 = vpop.eup %4396 }
 0x9e8   :  { %v1426_v45 = vsel %vm261_vm2, %v4397_v44, 0.0 }
 0x9e9   :  { %1427 = vadd.xlane.f32.xlu0 %v1426_v45 }
 0x9ff   :  { %1433 = vrot.lane.b32.xlu0 %v4685_v39, %s5299_s30  ;;  %v143_v39 = vld [vmem:[%s5328_s9 + $0x18] sm:$0xff]  ;;  %s5330_s9 = sld [smem:[#allocation14_spill]]  ;;  %s5342_s30 = smov 24  }
 0xa00   :  { %4143 = vmatprep.subr.mxu1 %v143_v39 }
 0xa03   :  { %1595 = vrot.lane.b32.xlu0 %v1173_v19, %s5297_s5  ;;  %s5331_s5 = sld [smem:[#allocation12_spill]] }
 0xa05   :  { %v149_v26 = vld [vmem:[%s5330_s9 + $0x10] sm:$0xff]  ;;  %v148_v27 = vld [vmem:[%s5330_s9 + $0x8] sm:$0xff]  ;;  %v147_v28 = vld [vmem:[%s5330_s9] sm:$0xff] }
 0xa09   :  { %v3870_v41 = vld [vmem:[%s5331_s5] ss:$0 sm:$0xff] }
 0xa6e   :  { %v1425_v46 = vpop.xlane.xlu0 %1424 }
 0xa6f   :  { %4398 = vrcp.f32 %v1425_v46 }
 0xa72   :  { %v1428_v47 = vpop.xlane.xlu0 %1427 }
 0xa73   :  { %4400 = vrcp.f32 %v1428_v47 }
 0xa76   :  { %v1434_v48 = vpop.permute.xlu0 %1433 }
 0xa77   :  { %4134 = vmatpush3.msra.mxu0 %v1434_v48 }
 0xa7a   :  { %v1596_v62 = vpop.permute.xlu0 %1595 }
 0xa7b   :  { %v1612_v1 = vsel %vm1611_vm4, %v1609_v63, %v1596_v62  ;;  %v153_v62 = vld [vmem:[%s5333_s4 + $0x8] sm:$0xff]  ;;  %v152_v63 = vld [vmem:[%s5333_s4] sm:$0xff] }
 0xa7c   :  { %v4399_v49 = vpop.eup %4398 }
 0xa7d   :  { %v1431_v50 = vmul.f32 %v4399_v49, %v4395_v37  ;;  %v167_v49 = vld [vmem:[%s5333_s4 + $0x78] sm:$0xff] }
 0xa7e   :  { %4165 = vmatprep.subr.mxu0 %v167_v49 }
 0xa7f   :  { %4136 = vmatmul.mubr.msk.f32.vlgmr.msra.gmra.mxu0 %vm261_vm2, %v1431_v50  ;;  %v166_v50 = vld [vmem:[%s5333_s4 + $0x70] sm:$0xff] }
 0xa80   :  { %v4401_v51 = vpop.eup %4400  ;;  %4166 = vmatpush3.msra.mxu0 %v167_v49 }
 0xa81   :  { %v1432_v52 = vmul.f32 %v4401_v51, %v4397_v44  ;;  %4167 = vmatprep.subr.mxu0 %v166_v50  ;;  %v165_v51 = vld [vmem:[%s5333_s4 + $0x68] sm:$0xff] }
 0xa82   :  { %4168 = vmatpush3.msra.mxu0 %v166_v50 }
 0xa83   :  { %4141 = vmatmul.mubr.msk.f32.vlgmr.msra.gmra.mxu1 %vm261_vm2, %v1432_v52  ;;  %4169 = vmatprep.subr.mxu0 %v165_v51  ;;  %v164_v52 = vld [vmem:[%s5333_s4 + $0x60] sm:$0xff] }
 0xa84   :  { %4144 = vmatpush3.msra.mxu1 %v143_v39  ;;  %4170 = vmatpush3.msra.mxu0 %v165_v51  ;;  %v163_v39 = vld [vmem:[%s5333_s4 + $0x58] sm:$0xff] }
 0xa85   :  { %4145 = vmatprep.subr.mxu1 %v142_v53  ;;  %4171 = vmatprep.subr.mxu0 %v164_v52 }
 0xa86   :  { %4146 = vmatpush3.msra.mxu1 %v142_v53  ;;  %4172 = vmatpush3.msra.mxu0 %v164_v52  ;;  %v162_v53 = vld [vmem:[%s5333_s4 + $0x50] sm:$0xff] }
 0xa87   :  { %4147 = vmatprep.subr.mxu1 %v141_v54  ;;  %4173 = vmatprep.subr.mxu0 %v163_v39 }
 0xa88   :  { %4148 = vmatpush3.msra.mxu1 %v141_v54  ;;  %4174 = vmatpush3.msra.mxu0 %v163_v39  ;;  %v161_v54 = vld [vmem:[%s5333_s4 + $0x48] sm:$0xff] }
 0xa89   :  { %4149 = vmatprep.subr.mxu1 %v140_v55  ;;  %4175 = vmatprep.subr.mxu0 %v162_v53 }
 0xa8a   :  { %4150 = vmatpush3.msra.mxu1 %v140_v55  ;;  %4176 = vmatpush3.msra.mxu0 %v162_v53  ;;  %v160_v55 = vld [vmem:[%s5333_s4 + $0x40] sm:$0xff] }
 0xa8b   :  { %4177 = vmatprep.subr.mxu0 %v161_v54 }
 0xa8c   :  { %4178 = vmatpush3.msra.mxu0 %v161_v54  ;;  %v3876_v54 = vld [vmem:[%s5275_s13] ss:$0 sm:$0xff] }
 0xa8d   :  { %4179 = vmatprep.subr.mxu0 %v160_v55 }
 0xa8e   :  { %4180 = vmatpush3.msra.mxu0 %v160_v55 }
 0xb3f   :  { %v1505_v56 = vpop.f32.mrf.mxu0 }
 0xb40   :  { %1603 = vrot.lane.b32.xlu0 %v1505_v56, %s5309_s28  ;;  %v159_v56 = vld [vmem:[%s5333_s4 + $0x38] sm:$0xff] }
 0xb41   :  { %v4137_v57 = vpop.f32.mrf.mxu0  ;;  %4181 = vmatprep.subr.mxu0 %v159_v56 }
 0xb42   :  { %v158_v57 = vld [vmem:[%s5333_s4 + $0x30] sm:$0xff]  ;;  %4182 = vmatpush3.msra.mxu0 %v159_v56 }
 0xb43   :  { %v1581_v58 = vpop.f32.mrf.mxu1  ;;  %4183 = vmatprep.subr.mxu0 %v158_v57 }
 0xb44   :  { %1605 = vrot.lane.b32.xlu1 %v1581_v58, %s5309_s28  ;;  %s5332_s28 = sld [smem:[#allocation13_spill]]  ;;  %v157_v58 = vld [vmem:[%s5333_s4 + $0x28] sm:$0xff]  ;;  %4184 = vmatpush3.msra.mxu0 %v158_v57 }
 0xb45   :  { %v4142_v59 = vpop.f32.mrf.mxu1  ;;  %4185 = vmatprep.subr.mxu0 %v157_v58 }
 0xb46   :  { %v156_v59 = vld [vmem:[%s5333_s4 + $0x20] sm:$0xff]  ;;  %4186 = vmatpush3.msra.mxu0 %v157_v58 }
 0xb47   :  { %4187 = vmatprep.subr.mxu0 %v156_v59 }
 0xb48   :  { %4188 = vmatpush3.msra.mxu0 %v156_v59  ;;  %v3877_v59 = vld [vmem:[%s5276_s14] ss:$0 sm:$0xff]  ;;  %s5335_s14 = smov 112  }
 0xb49   :  { %4189 = vmatprep.subr.mxu0 %v155_v60 }
 0xb4a   :  { %v3871_v37 = vld [vmem:[%s5332_s28] ss:$0 sm:$0xff]  ;;  %4190 = vmatpush3.msra.mxu0 %v155_v60 }
 0xb4b   :  { %4191 = vmatprep.subr.mxu0 %v154_v61 }
 0xb4c   :  { %4192 = vmatpush3.msra.mxu0 %v154_v61 }
 0xb4d   :  { %4193 = vmatprep.subr.mxu0 %v153_v62 }
 0xb4e   :  { %4194 = vmatpush3.msra.mxu0 %v153_v62 }
 0xb4f   :  { %4195 = vmatprep.subr.mxu0 %v152_v63 }
 0xb50   :  { %4196 = vmatpush3.msra.mxu0 %v152_v63  ;;  %v3878_v63 = vld [vmem:[%s5278_s16] ss:$0 sm:$0xff]  ;;  %s5336_s16 = smov 48  }
 0xb51   :  { %4241 = vmatprep.subr.mxu0 %v4480_v34 }
 0xbb2   :  { %v1604_v2 = vpop.permute.xlu0 %1603 }
 0xbb3   :  { %v1615_v3 = vsel %vm1614_vm3, %v1612_v1, %v1604_v2 }
 0xbb4   :  { %4151 = vmatprep.mubr.msk.f32.mxu1 %vm91_vm0, %v1615_v3 }
 0xbb6   :  { %v1606_v6 = vpop.permute.xlu1 %1605 }
 0xbb7   :  { %v1616_v7 = vsel %vm1614_vm3, %v1613_v5, %v1606_v6 }
 0xbb8   :  { %4152 = vmatmul.mubr.msk.f32.vlgmr.msra.gmra.mxu1 %vm91_vm0, %v1616_v7 }
 0xc78   :  { %v4153_v9 = vpop.f32.mrf.mxu1 }
 0xc79   :  { %v1701_v11 = vadd.f32 %v4153_v9, %v3867_v8 }
 0xc7a   :  { %v1695_v12 = vpop.f32.mrf.mxu1 }
 0xc7b   :  { %v1696_v13 = vadd.f32 %v3867_v8, %v1695_v12  ;;  %v1705_v14 = vadd.f32 %v1701_v11, %v4670_v33 }
 0xc7d   :  { %v1709_v15 = vsel %vm91_vm0, %v1705_v14, 0.0  ;;  %v1704_v10 = vadd.f32 %v1696_v13, %v4666_v31  ;;  %v150_v31 = vld [vmem:[%s5330_s9 + $0x18] sm:$0xff] }
 0xc7e   :  { %1710 = vadd.xlane.f32.xlu1 %v1709_v15  ;;  %4154 = vmatprep.subr.mxu1 %v150_v31 }
 0xc7f   :  { %v1706_v16 = vsel %vm91_vm0, %v1704_v10, 0.0  ;;  %4155 = vmatpush3.msra.mxu1 %v150_v31 }
 0xc80   :  { %1707 = vadd.xlane.f32.xlu0 %v1706_v16  ;;  %4156 = vmatprep.subr.mxu1 %v149_v26 }
 0xc81   :  { %4157 = vmatpush3.msra.mxu1 %v149_v26 }
 0xc82   :  { %4158 = vmatprep.subr.mxu1 %v148_v27 }
 0xc83   :  { %4159 = vmatpush3.msra.mxu1 %v148_v27 }
 0xc84   :  { %4160 = vmatprep.subr.mxu1 %v147_v28 }
 0xc85   :  { %4161 = vmatpush3.msra.mxu1 %v147_v28 }
 0xd07   :  { %v1711_v17 = vpop.xlane.xlu1 %1710 }
 0xd08   :  { %v1713_v18 = vmul.f32 0.03125, %v1711_v17 }
 0xd09   :  { %v1708_v19 = vpop.xlane.xlu0 %1707 }
 0xd0a   :  { %v1712_v20 = vmul.f32 0.03125, %v1708_v19  ;;  %v1715_v21 = vsub.f32 %v1705_v14, %v1713_v18 }
 0xd0c   :  { %v1714_v22 = vsub.f32 %v1704_v10, %v1712_v20  ;;  %v1717_v25 = vmul.f32 %v1715_v21, %v1715_v21 }
 0xd0e   :  { %v1716_v23 = vmul.f32 %v1714_v22, %v1714_v22  ;;  %v1721_v33 = vsel %vm91_vm0, %v1717_v25, 0.0 }
 0xd10   :  { %v1718_v24 = vsel %vm91_vm0, %v1716_v23, 0.0  ;;  %v3875_v23 = vld [vmem:[%s5274_s12] ss:$0 sm:$0xff]  ;;  %s4496_s12 = smov [#allocation2]  }
 0xd11   :  { %1719 = vadd.xlane.f32.xlu0 %v1718_v24  ;;  %s3827_s13 = sshll.u32 %s4496_s12, 4  ;;  %s3828_s13 = int_to_ptr.vmem [resolvable:$true] %s3827_s13 }
 0xd12   :  { %p4463_p1 = scmp.lt.s32.totalorder %s3828_s13, %s3828_s13 }
 0xd15   :  { %1722 = vadd.xlane.f32.xlu0 %v1721_v33 }
 0xd9a   :  { %v1720_v29 = vpop.xlane.xlu0 %1719 }
 0xd9b   :  { %v1724_v30 = vmul.f32 0.03125, %v1720_v29 }
 0xd9d   :  { %v1726_v32 = vadd.f32 1e-12, %v1724_v30 }
 0xd9e   :  { %v1723_v35 = vpop.xlane.xlu0 %1722 }
 0xd9f   :  { %4402 = vrsqrt.f32 %v1726_v32  ;;  %v1725_v36 = vmul.f32 0.03125, %v1723_v35 }
 0xda1   :  { %v1727_v38 = vadd.f32 1e-12, %v1725_v36 }
 0xda3   :  { %4404 = vrsqrt.f32 %v1727_v38 }
 0xdac   :  { %v4403_v40 = vpop.eup %4402 }
 0xdad   :  { %v1730_v42 = vmul.f32 %v4403_v40, %v1714_v22 }
 0xdaf   :  { %v1738_v43 = vmul.f32 %v3870_v41, %v1730_v42 }
 0xdb0   :  { %v4405_v44 = vpop.eup %4404 }
 0xdb1   :  { %v1731_v45 = vmul.f32 %v4405_v44, %v1715_v21  ;;  %v4880_v46 = vadd.f32 %v3871_v37, %v1738_v43  ;;  %v1981_v44 = vld [vmem:[%s5277_s15 + $0x18] sm:$0xff] }
 0xdb2   :  { %4200 = vmatprep.subr.mxu1 %v1981_v44 }
 0xdb3   :  { %v1739_v47 = vmul.f32 %v3870_v41, %v1731_v45  ;;  %4162 = vmatprep.mubr.msk.f32.mxu1 %vm91_vm0, %v4880_v46  ;;  %v1980_v45 = vld [vmem:[%s5277_s15 + $0x10] sm:$0xff] }
 0xdb5   :  { %v4884_v48 = vadd.f32 %v3871_v37, %v1739_v47  ;;  %v1978_v47 = vld [vmem:[%s5277_s15] sm:$0xff] }
 0xdb7   :  { %4163 = vmatmul.mubr.msk.f32.vlgmr.msra.gmra.mxu1 %vm91_vm0, %v4884_v48 }
 0xdb8   :  { %4201 = vmatpush3.msra.mxu1 %v1981_v44 }
 0xdb9   :  { %4202 = vmatprep.subr.mxu1 %v1980_v45 }
 0xdba   :  { %4203 = vmatpush3.msra.mxu1 %v1980_v45 }
 0xe77   :  { %v4164_v1 = vpop.f32.mrf.mxu1 }
 0xe78   :  { %v1832_v2 = vadd.f32 %v4164_v1, %v3872_v0 }
 0xe79   :  { %v1826_v3 = vpop.f32.mrf.mxu1 }
 0xe7a   :  { %v1838_v4 = vmul.f32 0.044715, %v1832_v2  ;;  %v1827_v5 = vadd.f32 %v3872_v0, %v1826_v3  ;;  %v1836_v20 = vmul.f32 0.5, %v1832_v2 }
 0xe7c   :  { %v1840_v6 = vmul.f32 %v1838_v4, %v1832_v2  ;;  %v1837_v7 = vmul.f32 0.044715, %v1827_v5  ;;  %v1835_v18 = vmul.f32 0.5, %v1827_v5 }
 0xe7e   :  { %v1842_v8 = vmul.f32 %v1840_v6, %v1832_v2  ;;  %v1839_v9 = vmul.f32 %v1837_v7, %v1827_v5 }
 0xe80   :  { %v1844_v11 = vadd.f32 %v1842_v8, %v1832_v2  ;;  %v1841_v12 = vmul.f32 %v1839_v9, %v1827_v5 }
 0xe82   :  { %v1843_v13 = vadd.f32 %v1841_v12, %v1827_v5  ;;  %v1846_v14 = vmul.f32 0.7978846, %v1844_v11 }
 0xe84   :  { %v1845_v15 = vmul.f32 0.7978846, %v1843_v13  ;;  %4406 = vtanh.f32 %v1846_v14 }
 0xe86   :  { %4408 = vtanh.f32 %v1845_v15 }
 0xe91   :  { %v4407_v10 = vpop.eup %4406 }
 0xe92   :  { %v1850_v17 = vadd.f32 1.0, %v4407_v10 }
 0xe93   :  { %v4409_v16 = vpop.eup %4408 }
 0xe94   :  { %v1849_v19 = vadd.f32 1.0, %v4409_v16  ;;  %v1852_v22 = vmul.f32 %v1850_v17, %v1836_v20 }
 0xe96   :  { %v1851_v21 = vmul.f32 %v1849_v19, %v1835_v18 }
 0xe98   :  { %4197 = vmatprep.mubr.f32.mxu0 %v1851_v21 }
 0xe99   :  { %4198 = vmatmul.mubr.f32.vlgmr.msra.gmra.mxu0 %v1852_v22 }
 0xe9a   :  { %4243 = vmatprep.mubr.msk.f32.mxu0 %vm4481_vm1, %v4480_v34 }
 0xf59   :  { %v4199_v24 = vpop.f32.mrf.mxu0 }
 0xf5a   :  { %v1931_v25 = vadd.f32 %v4199_v24, %v3875_v23 }
 0xf5b   :  { %v1925_v33 = vpop.f32.mrf.mxu0 }
 0xf5c   :  { %v1926_v31 = vadd.f32 %v3875_v23, %v1925_v33  ;;  %v1935_v26 = vadd.f32 %v1931_v25, %v4884_v48 }
 0xf5e   :  { %v1939_v27 = vsel %vm91_vm0, %v1935_v26, 0.0  ;;  %v1934_v28 = vadd.f32 %v1926_v31, %v4880_v46  ;;  %v1979_v46 = vld [vmem:[%s5277_s15 + $0x8] sm:$0xff] }
 0xf5f   :  { %1940 = vadd.xlane.f32.xlu1 %v1939_v27  ;;  %4204 = vmatprep.subr.mxu1 %v1979_v46 }
 0xf60   :  { %v1936_v29 = vsel %vm91_vm0, %v1934_v28, 0.0  ;;  %4205 = vmatpush3.msra.mxu1 %v1979_v46 }
 0xf61   :  { %1937 = vadd.xlane.f32.xlu0 %v1936_v29  ;;  %4206 = vmatprep.subr.mxu1 %v1978_v47 }
 0xf62   :  { %4207 = vmatpush3.msra.mxu1 %v1978_v47 }
 0xf63   :  { %4211 = vmatprep.subr.mxu1 %v4480_v34 }
 0xfe8   :  { %v1941_v30 = vpop.xlane.xlu1 %1940 }
 0xfe9   :  { %v1943_v32 = vmul.f32 0.03125, %v1941_v30 }
 0xfea   :  { %v1938_v35 = vpop.xlane.xlu0 %1937 }
 0xfeb   :  { %v1945_v36 = vsub.f32 %v1935_v26, %v1943_v32  ;;  %v1942_v38 = vmul.f32 0.03125, %v1938_v35 }
 0xfed   :  { %v1944_v40 = vsub.f32 %v1934_v28, %v1942_v38  ;;  %v1947_v41 = vmul.f32 %v1945_v36, %v1945_v36 }
 0xfef   :  { %v1951_v42 = vsel %vm91_vm0, %v1947_v41, 0.0  ;;  %v1946_v37 = vmul.f32 %v1944_v40, %v1944_v40 }
 0xff0   :  { %1952 = vadd.xlane.f32.xlu1 %v1951_v42 }
 0xff1   :  { %v1948_v43 = vsel %vm91_vm0, %v1946_v37, 0.0 }
 0xff2   :  { %1949 = vadd.xlane.f32.xlu0 %v1948_v43 }
0x1079   :  { %v1953_v48 = vpop.xlane.xlu1 %1952 }
0x107a   :  { %v1955_v49 = vmul.f32 0.03125, %v1953_v48 }
0x107b   :  { %v1950_v50 = vpop.xlane.xlu0 %1949 }
0x107c   :  { %v1957_v51 = vadd.f32 1e-12, %v1955_v49  ;;  %v1954_v52 = vmul.f32 0.03125, %v1950_v50 }
0x107e   :  { %4410 = vrsqrt.f32 %v1957_v51  ;;  %v1956_v39 = vadd.f32 1e-12, %v1954_v52 }
0x1080   :  { %4412 = vrsqrt.f32 %v1956_v39 }
0x108b   :  { %v4411_v53 = vpop.eup %4410 }
0x108c   :  { %v1961_v55 = vmul.f32 %v4411_v53, %v1945_v36 }
0x108d   :  { %v4413_v56 = vpop.eup %4412 }
0x108e   :  { %v1960_v57 = vmul.f32 %v4413_v56, %v1944_v40  ;;  %v1969_v58 = vmul.f32 %v3876_v54, %v1961_v55 }
0x1090   :  { %v1968_v60 = vmul.f32 %v3876_v54, %v1960_v57  ;;  %v4972_v62 = vadd.f32 %v3877_v59, %v1969_v58 }
0x1092   :  { %v4970_v61 = vadd.f32 %v3877_v59, %v1968_v60 }
0x1094   :  { %4208 = vmatprep.mubr.msk.f32.mxu1 %vm91_vm0, %v4970_v61 }
0x1095   :  { %4209 = vmatmul.mubr.msk.f32.vlgmr.msra.gmra.mxu1 %vm91_vm0, %v4972_v62 }
0x1096   :  { %4213 = vmatprep.mubr.msk.f32.mxu1 %vm4481_vm1, %v4480_v34 }
0x1155   :  { %v4210_v0 = vpop.f32.mrf.mxu1 }
0x1156   :  { %v4983_v1 = vadd.f32 %v4210_v0, %v3878_v63 }
0x1157   :  { %v2092_v2 = vpop.f32.mrf.mxu1 }
0x1158   :  { %v4985_v3 = vadd.f32 %v3878_v63, %v2092_v2  ;;  %2179 = vrot.lane.b32.xlu1 %v4983_v1, %s4482_s10 }
0x115a   :  { %2102 = vrot.lane.b32.xlu0 %v4985_v3, %s4482_s10  ;;  %s5337_s10 = smov 72  }
0x11ca   :  { %v2180_v5 = vpop.permute.xlu1 %2179 }
0x11cc   :  { %v2103_v4 = vpop.permute.xlu0 %2102 }
0x11cd   :  { %4212 = vmatpush3.xpose.msk.msra.mxu1 %vm261_vm2, %v2103_v4 }
0x11ce   :  { %4216 = vmatprep.subr.mxu1 %v4480_v34 }
0x11d0   :  { %4214 = vmatmul.mubr.msk.f32.vlgmr.msra.gmra.mxu1 %vm261_vm2, %v4985_v3 }
0x11d1   :  { %4217 = vmatpush3.xpose.msk.msra.mxu1 %vm261_vm2, %v2180_v5  ;;  %4218 = vmatprep.mubr.msk.f32.mxu1 %vm4481_vm1, %v4480_v34 }
0x11d2   :  { %4221 = vmatprep.subr.mxu1 %v4480_v34 }
0x11d4   :  { %4219 = vmatmul.mubr.msk.f32.vlgmr.msra.gmra.mxu1 %vm261_vm2, %v4983_v1 }
0x11d5   :  { %4223 = vmatprep.mubr.msk.f32.mxu1 %vm4481_vm1, %v4480_v34 }
0x1290   :  { %v2174_v6 = vpop.f32.mrf.mxu1 }
0x1291   :  { %v2255_v7 = vmul.f32 0.35355338, %v2174_v6 }
0x1292   :  { %v4215_v8 = vpop.f32.mrf.mxu1 }
0x1293   :  { %v2257_v9 = vsel %vm261_vm2, %v2255_v7, -inf }
0x1294   :  { %2258 = vmax.xlane.f32.xlu1 %v2257_v9  ;;  %v2251_v11 = vpop.f32.mrf.mxu1 }
0x1295   :  { %v2256_v12 = vmul.f32 0.35355338, %v2251_v11 }
0x1296   :  { %v4220_v13 = vpop.f32.mrf.mxu1 }
0x1297   :  { %v2260_v14 = vsel %vm261_vm2, %v2256_v12, -inf }
0x1298   :  { %2261 = vmax.xlane.f32.xlu0 %v2260_v14 }
0x12a5   :  { %2355 = vrot.lane.b32.xlu1 %v4983_v1, %s4483_s29 }
0x12a9   :  { %2433 = vrot.lane.b32.xlu1 %v4985_v3, %s4484_s1 }
0x12ad   :  { %2431 = vrot.lane.b32.xlu1 %v4985_v3, %s4485_s6 }
0x131d   :  { %v2259_v15 = vpop.xlane.xlu1 %2258 }
0x131e   :  { %v2263_v10 = vsub.f32 %v2255_v7, %v2259_v15 }
0x1320   :  { %v2265_v16 = vmul.f32 1.442695, %v2263_v10 }
0x1321   :  { %v2262_v17 = vpop.xlane.xlu0 %2261  ;;  %v2356_v24 = vpop.permute.xlu1 %2355 }
0x1322   :  { %4414 = vpow2.f32 %v2265_v16  ;;  %v2264_v18 = vsub.f32 %v2256_v12, %v2262_v17 }
0x1324   :  { %v2267_v19 = vmul.f32 1.442695, %v2264_v18 }
0x1325   :  { %v2434_v25 = vpop.permute.xlu1 %2433 }
0x1326   :  { %4416 = vpow2.f32 %v2267_v19 }
0x1329   :  { %v2432_v33 = vpop.permute.xlu1 %2431 }
0x132f   :  { %v4415_v20 = vpop.eup %4414 }
0x1330   :  { %v2269_v21 = vsel %vm261_vm2, %v4415_v20, 0.0 }
0x1331   :  { %2270 = vadd.xlane.f32.xlu0 %v2269_v21 }
0x1333   :  { %v4417_v22 = vpop.eup %4416 }
0x1334   :  { %v2272_v23 = vsel %vm261_vm2, %v4417_v22, 0.0 }
0x1335   :  { %2273 = vadd.xlane.f32.xlu1 %v2272_v23 }
0x1346   :  { %2509 = vrot.lane.b32.xlu1 %v4983_v1, %s4485_s6  ;;  %s5340_s6 = smov 8  }
0x1347   :  { %2279 = vrot.lane.b32.xlu0 %v4985_v3, %s4483_s29  ;;  %s5338_s29 = smov 104  }
0x134b   :  { %2511 = vrot.lane.b32.xlu0 %v4983_v1, %s4484_s1  ;;  %s5339_s1 = smov 40  }
0x13ba   :  { %v2271_v31 = vpop.xlane.xlu0 %2270 }
0x13bb   :  { %4418 = vrcp.f32 %v2271_v31 }
0x13be   :  { %v2274_v26 = vpop.xlane.xlu1 %2273  ;;  %v2280_v27 = vpop.permute.xlu0 %2279 }
0x13bf   :  { %4420 = vrcp.f32 %v2274_v26  ;;  %4222 = vmatpush3.msra.mxu1 %v2280_v27 }
0x13c0   :  { %4226 = vmatprep.subr.mxu1 %v4480_v34 }
0x13c2   :  { %v2512_v35 = vpop.permute.xlu0 %2511  ;;  %v2510_v36 = vpop.permute.xlu1 %2509 }
0x13c8   :  { %v4419_v28 = vpop.eup %4418 }
0x13c9   :  { %v2277_v29 = vmul.f32 %v4419_v28, %v4415_v20 }
0x13cb   :  { %4224 = vmatmul.mubr.msk.f32.vlgmr.msra.gmra.mxu1 %vm261_vm2, %v2277_v29 }
0x13cc   :  { %v4421_v30 = vpop.eup %4420  ;;  %4227 = vmatpush3.msra.mxu1 %v2356_v24  ;;  %4228 = vmatprep.mubr.msk.f32.mxu1 %vm4481_vm1, %v4480_v34 }
0x13cd   :  { %4231 = vmatprep.subr.mxu1 %v4480_v34  ;;  %v2278_v32 = vmul.f32 %v4421_v30, %v4417_v22 }
0x13cf   :  { %4229 = vmatmul.mubr.msk.f32.vlgmr.msra.gmra.mxu1 %vm261_vm2, %v2278_v32 }
0x13d0   :  { %4232 = vmatpush3.xpose.msk.msra.mxu1 %vm261_vm2, %v2434_v25  ;;  %4233 = vmatprep.mubr.msk.f32.mxu1 %vm4481_vm1, %v4480_v34 }
0x13d1   :  { %4236 = vmatprep.subr.mxu1 %v4480_v34 }
0x13d3   :  { %4234 = vmatmul.mubr.msk.f32.vlgmr.msra.gmra.mxu1 %vm261_vm2, %v2432_v33 }
0x13d4   :  { %4237 = vmatpush3.xpose.msk.msra.mxu1 %vm261_vm2, %v2512_v35  ;;  %4238 = vmatprep.mubr.msk.f32.mxu1 %vm4481_vm1, %v4480_v34 }
0x13d5   :  { %4246 = vmatprep.subr.mxu1 %v4480_v34 }
0x13d7   :  { %4239 = vmatmul.mubr.msk.f32.vlgmr.msra.gmra.mxu1 %vm261_vm2, %v2510_v36 }
0x13d8   :  { %4248 = vmatprep.mubr.msk.f32.mxu1 %vm4481_vm1, %v4480_v34 }
0x148b   :  { %v5037_v38 = vpop.f32.mrf.mxu1 }
0x148d   :  { %v4225_v40 = vpop.f32.mrf.mxu1 }
0x148f   :  { %v5039_v41 = vpop.f32.mrf.mxu1 }
0x1491   :  { %v4230_v42 = vpop.f32.mrf.mxu1 }
0x1493   :  { %v2505_v37 = vpop.f32.mrf.mxu1 }
0x1494   :  { %v2587_v43 = vmul.f32 0.35355338, %v2505_v37 }
0x1495   :  { %v4235_v44 = vpop.f32.mrf.mxu1 }
0x1496   :  { %v2589_v45 = vsel %vm261_vm2, %v2587_v43, -inf }
0x1497   :  { %2590 = vmax.xlane.f32.xlu0 %v2589_v45  ;;  %v2583_v46 = vpop.f32.mrf.mxu1 }
0x1498   :  { %v2588_v47 = vmul.f32 0.35355338, %v2583_v46 }
0x1499   :  { %v4240_v48 = vpop.f32.mrf.mxu1 }
0x149a   :  { %v2592_v49 = vsel %vm261_vm2, %v2588_v47, -inf }
0x149b   :  { %2593 = vmax.xlane.f32.xlu1 %v2592_v49 }
0x14ac   :  { %2687 = vrot.lane.b32.xlu1 %v4983_v1, %s4486_s11 }
0x14ad   :  { %2611 = vrot.lane.b32.xlu0 %v4985_v3, %s4486_s11  ;;  %s5341_s11 = smov 16  }
0x14b0   :  { %2765 = vrot.lane.b32.xlu1 %v4985_v3, %s4487_s2 }
0x14b4   :  { %2843 = vrot.lane.b32.xlu1 %v4983_v1, %s4487_s2 }
0x14b8   :  { %2841 = vrot.lane.b32.xlu1 %v4983_v1, %s5335_s14 }
0x1520   :  { %v2591_v50 = vpop.xlane.xlu0 %2590 }
0x1521   :  { %v2595_v51 = vsub.f32 %v2587_v43, %v2591_v50 }
0x1523   :  { %v2597_v52 = vmul.f32 1.442695, %v2595_v51 }
0x1524   :  { %v2612_v39 = vpop.permute.xlu0 %2611  ;;  %v2594_v53 = vpop.xlane.xlu1 %2593 }
0x1525   :  { %4422 = vpow2.f32 %v2597_v52  ;;  %v2596_v54 = vsub.f32 %v2588_v47, %v2594_v53  ;;  %4242 = vmatpush3.msra.mxu0 %v2612_v39 }
0x1526   :  { %4251 = vmatprep.subr.mxu0 %v4480_v34 }
0x1527   :  { %v2599_v55 = vmul.f32 1.442695, %v2596_v54 }
0x1528   :  { %v2688_v56 = vpop.permute.xlu1 %2687 }
0x1529   :  { %4424 = vpow2.f32 %v2599_v55  ;;  %4247 = vmatpush3.msra.mxu1 %v2688_v56 }
0x152a   :  { %4256 = vmatprep.subr.mxu1 %v4480_v34 }
0x152c   :  { %v2766_v2 = vpop.permute.xlu1 %2765 }
0x1530   :  { %v2844_v7 = vpop.permute.xlu1 %2843 }
0x1532   :  { %v4423_v57 = vpop.eup %4422 }
0x1533   :  { %v2601_v58 = vsel %vm261_vm2, %v4423_v57, 0.0 }
0x1534   :  { %2602 = vadd.xlane.f32.xlu0 %v2601_v58  ;;  %v2842_v11 = vpop.permute.xlu1 %2841 }
0x1536   :  { %v4425_v59 = vpop.eup %4424 }
0x1537   :  { %v2604_v60 = vsel %vm261_vm2, %v4425_v59, 0.0 }
0x1538   :  { %2605 = vadd.xlane.f32.xlu0 %v2604_v60 }
0x154e   :  { %2763 = vrot.lane.b32.xlu0 %v4985_v3, %s5335_s14 }
0x15bd   :  { %v2603_v63 = vpop.xlane.xlu0 %2602 }
0x15be   :  { %4426 = vrcp.f32 %v2603_v63 }
0x15c1   :  { %v2606_v0 = vpop.xlane.xlu0 %2605 }
0x15c2   :  { %4428 = vrcp.f32 %v2606_v0 }
0x15c5   :  { %v2764_v9 = vpop.permute.xlu0 %2763 }
0x15cb   :  { %v4427_v4 = vpop.eup %4426 }
0x15cc   :  { %v2609_v5 = vmul.f32 %v4427_v4, %v4423_v57 }
0x15ce   :  { %4244 = vmatmul.mubr.msk.f32.vlgmr.msra.gmra.mxu0 %vm261_vm2, %v2609_v5 }
0x15cf   :  { %v4429_v6 = vpop.eup %4428  ;;  %4252 = vmatpush3.xpose.msk.msra.mxu0 %vm261_vm2, %v2766_v2  ;;  %4253 = vmatprep.mubr.msk.f32.mxu0 %vm4481_vm1, %v4480_v34 }
0x15d0   :  { %v2610_v8 = vmul.f32 %v4429_v6, %v4425_v59  ;;  %4261 = vmatprep.subr.mxu0 %v4480_v34 }
0x15d2   :  { %4249 = vmatmul.mubr.msk.f32.vlgmr.msra.gmra.mxu1 %vm261_vm2, %v2610_v8  ;;  %4254 = vmatmul.mubr.msk.f32.vlgmr.msra.gmra.mxu0 %vm261_vm2, %v2764_v9 }
0x15d3   :  { %4257 = vmatpush3.xpose.msk.msra.mxu1 %vm261_vm2, %v2844_v7  ;;  %4258 = vmatprep.mubr.msk.f32.mxu1 %vm4481_vm1, %v4480_v34 }
0x15d4   :  { %4266 = vmatprep.subr.mxu1 %v4480_v34  ;;  %4263 = vmatprep.mubr.msk.f32.mxu0 %vm4481_vm1, %v4480_v34 }
0x15d6   :  { %4259 = vmatmul.mubr.msk.f32.vlgmr.msra.gmra.mxu1 %vm261_vm2, %v2842_v11 }
0x15d7   :  { %4268 = vmatprep.mubr.msk.f32.mxu1 %vm4481_vm1, %v4480_v34 }
0x168e   :  { %v5075_v12 = vpop.f32.mrf.mxu0 }
0x1690   :  { %v4245_v13 = vpop.f32.mrf.mxu0 }
0x1692   :  { %v5077_v14 = vpop.f32.mrf.mxu1  ;;  %v2837_v15 = vpop.f32.mrf.mxu0 }
0x1693   :  { %v2919_v10 = vmul.f32 0.35355338, %v2837_v15 }
0x1694   :  { %v4250_v16 = vpop.f32.mrf.mxu1  ;;  %v4255_v17 = vpop.f32.mrf.mxu0 }
0x1695   :  { %v2921_v18 = vsel %vm261_vm2, %v2919_v10, -inf  ;;  %v1985_v16 = vld [vmem:[%s5279_s17 + $0x10] sm:$0xff]  ;;  %v1984_v17 = vld [vmem:[%s5279_s17 + $0x8] sm:$0xff] }
0x1696   :  { %2922 = vmax.xlane.f32.xlu0 %v2921_v18  ;;  %v2915_v19 = vpop.f32.mrf.mxu1  ;;  %v1983_v18 = vld [vmem:[%s5279_s17] sm:$0xff] }
0x1697   :  { %v2920_v20 = vmul.f32 0.35355338, %v2915_v19 }
0x1698   :  { %v4260_v21 = vpop.f32.mrf.mxu1 }
0x1699   :  { %v2924_v22 = vsel %vm261_vm2, %v2920_v20, -inf }
0x169a   :  { %2925 = vmax.xlane.f32.xlu1 %v2924_v22 }
0x16ab   :  { %3019 = vrot.lane.b32.xlu1 %v4983_v1, %s5336_s16 }
0x16ac   :  { %2943 = vrot.lane.b32.xlu0 %v4985_v3, %s5336_s16 }
0x16af   :  { %3097 = vrot.lane.b32.xlu1 %v4985_v3, %s5337_s10 }
0x16b3   :  { %3175 = vrot.lane.b32.xlu1 %v4983_v1, %s5337_s10 }
0x16b7   :  { %3173 = vrot.lane.b32.xlu1 %v4983_v1, %s5338_s29 }
0x171f   :  { %v2923_v23 = vpop.xlane.xlu0 %2922 }
0x1720   :  { %v2927_v24 = vsub.f32 %v2919_v10, %v2923_v23 }
0x1722   :  { %v2929_v25 = vmul.f32 1.442695, %v2927_v24 }
0x1723   :  { %v2944_v33 = vpop.permute.xlu0 %2943  ;;  %v2926_v31 = vpop.xlane.xlu1 %2925 }
0x1724   :  { %4430 = vpow2.f32 %v2929_v25  ;;  %v2928_v26 = vsub.f32 %v2920_v20, %v2926_v31  ;;  %4262 = vmatpush3.msra.mxu0 %v2944_v33 }
0x1725   :  { %4271 = vmatprep.subr.mxu0 %v4480_v34 }
0x1726   :  { %v2931_v27 = vmul.f32 1.442695, %v2928_v26 }
0x1727   :  { %v3020_v28 = vpop.permute.xlu1 %3019 }
0x1728   :  { %4432 = vpow2.f32 %v2931_v27  ;;  %4267 = vmatpush3.msra.mxu1 %v3020_v28 }
0x1729   :  { %4276 = vmatprep.subr.mxu1 %v4480_v34 }
0x172b   :  { %v3098_v42 = vpop.permute.xlu1 %3097 }
0x172f   :  { %v3176_v45 = vpop.permute.xlu1 %3175 }
0x1731   :  { %v4431_v29 = vpop.eup %4430 }
0x1732   :  { %v2933_v30 = vsel %vm261_vm2, %v4431_v29, 0.0 }
0x1733   :  { %2934 = vadd.xlane.f32.xlu0 %v2933_v30  ;;  %v3174_v48 = vpop.permute.xlu1 %3173 }
0x1735   :  { %v4433_v32 = vpop.eup %4432 }
0x1736   :  { %v2936_v35 = vsel %vm261_vm2, %v4433_v32, 0.0 }
0x1737   :  { %2937 = vadd.xlane.f32.xlu0 %v2936_v35 }
0x174d   :  { %3095 = vrot.lane.b32.xlu0 %v4985_v3, %s5338_s29 }
0x17bc   :  { %v2935_v36 = vpop.xlane.xlu0 %2934 }
0x17bd   :  { %4434 = vrcp.f32 %v2935_v36 }
0x17c0   :  { %v2938_v40 = vpop.xlane.xlu0 %2937 }
0x17c1   :  { %4436 = vrcp.f32 %v2938_v40 }
0x17c4   :  { %v3096_v47 = vpop.permute.xlu0 %3095 }
0x17ca   :  { %v4435_v37 = vpop.eup %4434 }
0x17cb   :  { %v2941_v43 = vmul.f32 %v4435_v37, %v4431_v29 }
0x17cd   :  { %4264 = vmatmul.mubr.msk.f32.vlgmr.msra.gmra.mxu0 %vm261_vm2, %v2941_v43 }
0x17ce   :  { %v4437_v44 = vpop.eup %4436  ;;  %4272 = vmatpush3.xpose.msk.msra.mxu0 %vm261_vm2, %v3098_v42  ;;  %4273 = vmatprep.mubr.msk.f32.mxu0 %vm4481_vm1, %v4480_v34 }
0x17cf   :  { %v2942_v46 = vmul.f32 %v4437_v44, %v4433_v32  ;;  %4281 = vmatprep.subr.mxu0 %v4480_v34 }
0x17d1   :  { %4269 = vmatmul.mubr.msk.f32.vlgmr.msra.gmra.mxu1 %vm261_vm2, %v2942_v46  ;;  %4274 = vmatmul.mubr.msk.f32.vlgmr.msra.gmra.mxu0 %vm261_vm2, %v3096_v47 }
0x17d2   :  { %4277 = vmatpush3.xpose.msk.msra.mxu1 %vm261_vm2, %v3176_v45  ;;  %4278 = vmatprep.mubr.msk.f32.mxu1 %vm4481_vm1, %v4480_v34 }
0x17d3   :  { %4286 = vmatprep.subr.mxu1 %v4480_v34  ;;  %4283 = vmatprep.mubr.msk.f32.mxu0 %vm4481_vm1, %v4480_v34 }
0x17d5   :  { %4279 = vmatmul.mubr.msk.f32.vlgmr.msra.gmra.mxu1 %vm261_vm2, %v3174_v48 }
0x17d6   :  { %4288 = vmatprep.mubr.msk.f32.mxu1 %vm4481_vm1, %v4480_v34 }
0x188d   :  { %v3015_v49 = vpop.f32.mrf.mxu0 }
0x188f   :  { %v4265_v50 = vpop.f32.mrf.mxu0 }
0x1891   :  { %v3091_v51 = vpop.f32.mrf.mxu1  ;;  %v3169_v52 = vpop.f32.mrf.mxu0 }
0x1892   :  { %v3251_v39 = vmul.f32 0.35355338, %v3169_v52 }
0x1893   :  { %v4270_v53 = vpop.f32.mrf.mxu1  ;;  %v4275_v54 = vpop.f32.mrf.mxu0 }
0x1894   :  { %v3253_v55 = vsel %vm261_vm2, %v3251_v39, -inf }
0x1895   :  { %3254 = vmax.xlane.f32.xlu0 %v3253_v55  ;;  %v3247_v56 = vpop.f32.mrf.mxu1  ;;  %v1993_v55 = vld [vmem:[%s5283_s21 + $0x18] sm:$0xff] }
0x1896   :  { %v3252_v57 = vmul.f32 0.35355338, %v3247_v56  ;;  %v1992_v56 = vld [vmem:[%s5283_s21 + $0x10] sm:$0xff] }
0x1897   :  { %v4280_v58 = vpop.f32.mrf.mxu1 }
0x1898   :  { %v3256_v59 = vsel %vm261_vm2, %v3252_v57, -inf  ;;  %v1990_v58 = vld [vmem:[%s5283_s21] sm:$0xff] }
0x1899   :  { %3257 = vmax.xlane.f32.xlu1 %v3256_v59 }
0x18aa   :  { %3351 = vrot.lane.b32.xlu1 %v4983_v1, %s5339_s1 }
0x18ae   :  { %3429 = vrot.lane.b32.xlu1 %v5075_v12, %s5340_s6 }
0x18b2   :  { %3431 = vrot.lane.b32.xlu1 %v5077_v14, %s5340_s6 }
0x18b6   :  { %3439 = vrot.lane.b32.xlu1 %v3091_v51, %s5341_s11 }
0x191e   :  { %v3255_v34 = vpop.xlane.xlu0 %3254 }
0x191f   :  { %v3259_v60 = vsub.f32 %v3251_v39, %v3255_v34 }
0x1921   :  { %v3261_v63 = vmul.f32 1.442695, %v3259_v60 }
0x1922   :  { %v3258_v0 = vpop.xlane.xlu1 %3257 }
0x1923   :  { %4438 = vpow2.f32 %v3261_v63  ;;  %v3260_v2 = vsub.f32 %v3252_v57, %v3258_v0  ;;  %v1991_v57 = vld [vmem:[%s5283_s21 + $0x8] sm:$0xff] }
0x1925   :  { %v3263_v4 = vmul.f32 1.442695, %v3260_v2 }
0x1926   :  { %v3352_v5 = vpop.permute.xlu1 %3351 }
0x1927   :  { %4440 = vpow2.f32 %v3263_v4  ;;  %4287 = vmatpush3.msra.mxu1 %v3352_v5  ;;  %v3908_v5 = vld [vmem:[%s5281_s19] ss:$0 sm:$0xff] }
0x1928   :  { %4302 = vmatprep.subr.mxu1 %v1993_v55 }
0x192a   :  { %v3430_v23 = vpop.permute.xlu1 %3429 }
0x192b   :  { %v3451_v33 = vsel %vm261_vm2, %v5037_v38, %v3430_v23  ;;  %v3905_v38 = vld [vmem:[%s5280_s18] ss:$0 sm:$0xff] }
0x192c   :  { %v1999_v23 = vld [vmem:[%s5285_s23 + $0x20] sm:$0xff] }
0x192e   :  { %v3432_v24 = vpop.permute.xlu1 %3431 }
0x192f   :  { %v3452_v29 = vsel %vm261_vm2, %v5039_v41, %v3432_v24  ;;  %v1998_v24 = vld [vmem:[%s5285_s23 + $0x18] sm:$0xff] }
0x1930   :  { %v4439_v6 = vpop.eup %4438 }
0x1931   :  { %v3265_v1 = vsel %vm261_vm2, %v4439_v6, 0.0 }
0x1932   :  { %3266 = vadd.xlane.f32.xlu0 %v3265_v1  ;;  %v3440_v31 = vpop.permute.xlu1 %3439  ;;  %v3909_v1 = vld [vmem:[%s5282_s20] ss:$0 sm:$0xff] }
0x1933   :  { %v3454_v30 = vsel %vm1611_vm4, %v3452_v29, %v3440_v31  ;;  %v1995_v31 = vld [vmem:[%s5285_s23] sm:$0xff] }
0x1934   :  { %v4441_v7 = vpop.eup %4440 }
0x1935   :  { %v3268_v8 = vsel %vm261_vm2, %v4441_v7, 0.0 }
0x1936   :  { %3269 = vadd.xlane.f32.xlu0 %v3268_v8 }
0x194c   :  { %3275 = vrot.lane.b32.xlu0 %v4985_v3, %s5339_s1  ;;  %v1986_v3 = vld [vmem:[%s5279_s17 + $0x18] sm:$0xff] }
0x1950   :  { %3437 = vrot.lane.b32.xlu0 %v3015_v49, %s5341_s11 }
0x19bb   :  { %v3267_v9 = vpop.xlane.xlu0 %3266 }
0x19bc   :  { %4442 = vrcp.f32 %v3267_v9 }
0x19bf   :  { %v3270_v11 = vpop.xlane.xlu0 %3269 }
0x19c0   :  { %4444 = vrcp.f32 %v3270_v11 }
0x19c3   :  { %v3276_v12 = vpop.permute.xlu0 %3275 }
0x19c4   :  { %4282 = vmatpush3.msra.mxu0 %v3276_v12 }
0x19c5   :  { %4291 = vmatprep.subr.mxu0 %v1986_v3 }
0x19c7   :  { %v3438_v25 = vpop.permute.xlu0 %3437 }
0x19c8   :  { %v3453_v26 = vsel %vm1611_vm4, %v3451_v33, %v3438_v25  ;;  %v1997_v25 = vld [vmem:[%s5285_s23 + $0x10] sm:$0xff]  ;;  %v1996_v33 = vld [vmem:[%s5285_s23 + $0x8] sm:$0xff] }
0x19c9   :  { %v4443_v13 = vpop.eup %4442 }
0x19ca   :  { %v3273_v14 = vmul.f32 %v4443_v13, %v4439_v6 }
0x19cc   :  { %4284 = vmatmul.mubr.msk.f32.vlgmr.msra.gmra.mxu0 %vm261_vm2, %v3273_v14  ;;  %v2010_v14 = vld [vmem:[%s5285_s23 + $0x78] sm:$0xff] }
0x19cd   :  { %v4445_v15 = vpop.eup %4444  ;;  %4292 = vmatpush3.msra.mxu0 %v1986_v3  ;;  %v2007_v3 = vld [vmem:[%s5285_s23 + $0x60] sm:$0xff] }
0x19ce   :  { %v3274_v10 = vmul.f32 %v4445_v15, %v4441_v7  ;;  %4293 = vmatprep.subr.mxu0 %v1985_v16  ;;  %v2009_v15 = vld [vmem:[%s5285_s23 + $0x70] sm:$0xff] }
0x19cf   :  { %4294 = vmatpush3.msra.mxu0 %v1985_v16  ;;  %v2006_v16 = vld [vmem:[%s5285_s23 + $0x58] sm:$0xff] }
0x19d0   :  { %4289 = vmatmul.mubr.msk.f32.vlgmr.msra.gmra.mxu1 %vm261_vm2, %v3274_v10  ;;  %4295 = vmatprep.subr.mxu0 %v1984_v17  ;;  %v2008_v10 = vld [vmem:[%s5285_s23 + $0x68] sm:$0xff] }
0x19d1   :  { %4296 = vmatpush3.msra.mxu0 %v1984_v17  ;;  %4303 = vmatpush3.msra.mxu1 %v1993_v55  ;;  %v2005_v17 = vld [vmem:[%s5285_s23 + $0x50] sm:$0xff] }
0x19d2   :  { %4297 = vmatprep.subr.mxu0 %v1983_v18  ;;  %4304 = vmatprep.subr.mxu1 %v1992_v56 }
0x19d3   :  { %4298 = vmatpush3.msra.mxu0 %v1983_v18  ;;  %4305 = vmatpush3.msra.mxu1 %v1992_v56  ;;  %v2004_v18 = vld [vmem:[%s5285_s23 + $0x48] sm:$0xff] }
0x19d4   :  { %4306 = vmatprep.subr.mxu1 %v1991_v57  ;;  %4313 = vmatprep.subr.mxu0 %v2010_v14 }
0x19d5   :  { %4307 = vmatpush3.msra.mxu1 %v1991_v57 }
0x19d6   :  { %4308 = vmatprep.subr.mxu1 %v1990_v58 }
0x19d7   :  { %4309 = vmatpush3.msra.mxu1 %v1990_v58 }
0x1a8c   :  { %v3347_v19 = vpop.f32.mrf.mxu0 }
0x1a8d   :  { %3445 = vrot.lane.b32.xlu0 %v3347_v19, %s5342_s30  ;;  %v2003_v19 = vld [vmem:[%s5285_s23 + $0x40] sm:$0xff] }
0x1a8e   :  { %v4285_v20 = vpop.f32.mrf.mxu0 }
0x1a8f   :  { %v2002_v20 = vld [vmem:[%s5285_s23 + $0x38] sm:$0xff] }
0x1a90   :  { %v3423_v21 = vpop.f32.mrf.mxu1 }
0x1a91   :  { %3447 = vrot.lane.b32.xlu1 %v3423_v21, %s5342_s30  ;;  %v2001_v21 = vld [vmem:[%s5285_s23 + $0x30] sm:$0xff] }
0x1a92   :  { %v4290_v22 = vpop.f32.mrf.mxu1 }
0x1a93   :  { %v2000_v22 = vld [vmem:[%s5285_s23 + $0x28] sm:$0xff] }
0x1aff   :  { %v3446_v27 = vpop.permute.xlu0 %3445 }
0x1b00   :  { %v3455_v28 = vsel %vm1614_vm3, %v3453_v26, %v3446_v27  ;;  %v3910_v26 = vld [vmem:[%s5284_s22] ss:$0 sm:$0xff] }
0x1b01   :  { %4299 = vmatprep.mubr.msk.f32.mxu0 %vm91_vm0, %v3455_v28 }
0x1b03   :  { %v3448_v32 = vpop.permute.xlu1 %3447 }
0x1b04   :  { %v3456_v35 = vsel %vm1614_vm3, %v3454_v30, %v3448_v32 }
0x1b05   :  { %4300 = vmatmul.mubr.msk.f32.vlgmr.msra.gmra.mxu0 %vm91_vm0, %v3456_v35 }
0x1b06   :  { %4314 = vmatpush3.msra.mxu0 %v2010_v14 }
0x1b07   :  { %4315 = vmatprep.subr.mxu0 %v2009_v15 }
0x1b08   :  { %4316 = vmatpush3.msra.mxu0 %v2009_v15 }
0x1b09   :  { %4317 = vmatprep.subr.mxu0 %v2008_v10 }
0x1b0a   :  { %4318 = vmatpush3.msra.mxu0 %v2008_v10 }
0x1b0b   :  { %4319 = vmatprep.subr.mxu0 %v2007_v3 }
0x1b0c   :  { %4320 = vmatpush3.msra.mxu0 %v2007_v3  ;;  %v3914_v3 = vld [vmem:[%s5287_s25] ss:$0 sm:$0xff]  ;;  %s4458_s25 = scalar_lea.vmem %s3828_s13, 256 }
0x1b0d   :  { %4321 = vmatprep.subr.mxu0 %v2006_v16  ;;  %p4459_p0 = scmp.ne.s32.totalorder %s3828_s13, %s4458_s25  ;;  %p4464_p2 = scmp.lt.s32.totalorder %s4458_s25, %s4458_s25 }
0x1b0e   :  { %4322 = vmatpush3.msra.mxu0 %v2006_v16 }
0x1b0f   :  { %4323 = vmatprep.subr.mxu0 %v2005_v17  ;;  %p4465_p3 = por %p4464_p2, %p4463_p1 }
0x1b10   :  { %4324 = vmatpush3.msra.mxu0 %v2005_v17 }
0x1b11   :  { %4325 = vmatprep.subr.mxu0 %v2004_v18  ;;  %p4466_p4 = pnand %p4465_p3, %p4459_p0 }
0x1b12   :  { %4326 = vmatpush3.msra.mxu0 %v2004_v18  ;;  %v3915_v18 = vld [vmem:[%s5288_s26] ss:$0 sm:$0xff] }
0x1b13   :  { %4327 = vmatprep.subr.mxu0 %v2003_v19 }
0x1b14   :  { %4328 = vmatpush3.msra.mxu0 %v2003_v19 }
0x1b15   :  { %4329 = vmatprep.subr.mxu0 %v2002_v20 }
0x1b16   :  { %4330 = vmatpush3.msra.mxu0 %v2002_v20 }
0x1b17   :  { %4331 = vmatprep.subr.mxu0 %v2001_v21 }
0x1b18   :  { %4332 = vmatpush3.msra.mxu0 %v2001_v21 }
0x1b19   :  { %4333 = vmatprep.subr.mxu0 %v2000_v22 }
0x1b1a   :  { %4334 = vmatpush3.msra.mxu0 %v2000_v22 }
0x1b1b   :  { %4335 = vmatprep.subr.mxu0 %v1999_v23 }
0x1b1c   :  { %4336 = vmatpush3.msra.mxu0 %v1999_v23 }
0x1b1d   :  { %4337 = vmatprep.subr.mxu0 %v1998_v24 }
0x1b1e   :  { %4338 = vmatpush3.msra.mxu0 %v1998_v24 }
0x1b1f   :  { %4339 = vmatprep.subr.mxu0 %v1997_v25 }
0x1b20   :  { %4340 = vmatpush3.msra.mxu0 %v1997_v25 }
0x1b21   :  { %4341 = vmatprep.subr.mxu0 %v1996_v33 }
0x1b22   :  { %4342 = vmatpush3.msra.mxu0 %v1996_v33 }
0x1b23   :  { %4343 = vmatprep.subr.mxu0 %v1995_v31 }
0x1b24   :  { %4344 = vmatpush3.msra.mxu0 %v1995_v31 }
0x1bc5   :  { %v4301_v36 = vpop.f32.mrf.mxu0 }
0x1bc6   :  { %v3541_v40 = vadd.f32 %v4301_v36, %v3905_v38 }
0x1bc7   :  { %v3535_v42 = vpop.f32.mrf.mxu0 }
0x1bc8   :  { %v3545_v37 = vadd.f32 %v3541_v40, %v4972_v62  ;;  %v3536_v43 = vadd.f32 %v3905_v38, %v3535_v42 }
0x1bca   :  { %v3544_v44 = vadd.f32 %v3536_v43, %v4970_v61  ;;  %v3549_v41 = vsel %vm91_vm0, %v3545_v37, 0.0 }
0x1bcb   :  { %3550 = vadd.xlane.f32.xlu1 %v3549_v41 }
0x1bcc   :  { %v3546_v45 = vsel %vm91_vm0, %v3544_v44, 0.0 }
0x1bcd   :  { %3547 = vadd.xlane.f32.xlu0 %v3546_v45 }
0x1c54   :  { %v3551_v46 = vpop.xlane.xlu1 %3550 }
0x1c55   :  { %v3553_v47 = vmul.f32 0.03125, %v3551_v46 }
0x1c56   :  { %v3548_v48 = vpop.xlane.xlu0 %3547 }
0x1c57   :  { %v3552_v49 = vmul.f32 0.03125, %v3548_v48  ;;  %v3555_v50 = vsub.f32 %v3545_v37, %v3553_v47 }
0x1c59   :  { %v3554_v51 = vsub.f32 %v3544_v44, %v3552_v49  ;;  %v3557_v53 = vmul.f32 %v3555_v50, %v3555_v50 }
0x1c5b   :  { %v3556_v52 = vmul.f32 %v3554_v51, %v3554_v51  ;;  %v3561_v54 = vsel %vm91_vm0, %v3557_v53, 0.0 }
0x1c5d   :  { %v3558_v39 = vsel %vm91_vm0, %v3556_v52, 0.0 }
0x1c5e   :  { %3559 = vadd.xlane.f32.xlu0 %v3558_v39  ;;  %v3913_v39 = vld [vmem:[%s5286_s24] ss:$0 sm:$0xff] }
0x1c62   :  { %3562 = vadd.xlane.f32.xlu0 %v3561_v54 }
0x1ce7   :  { %v3560_v59 = vpop.xlane.xlu0 %3559 }
0x1ce8   :  { %v3564_v34 = vmul.f32 0.03125, %v3560_v59 }
0x1cea   :  { %v3566_v60 = vadd.f32 1e-12, %v3564_v34 }
0x1ceb   :  { %v3563_v63 = vpop.xlane.xlu0 %3562 }
0x1cec   :  { %4446 = vrsqrt.f32 %v3566_v60  ;;  %v3565_v0 = vmul.f32 0.03125, %v3563_v63 }
0x1cee   :  { %v3567_v2 = vadd.f32 1e-12, %v3565_v0 }
0x1cf0   :  { %4448 = vrsqrt.f32 %v3567_v2 }
0x1cf9   :  { %v4447_v4 = vpop.eup %4446 }
0x1cfa   :  { %v3570_v6 = vmul.f32 %v4447_v4, %v3554_v51 }
0x1cfc   :  { %v3578_v7 = vmul.f32 %v3908_v5, %v3570_v6 }
0x1cfd   :  { %v4449_v8 = vpop.eup %4448 }
0x1cfe   :  { %v3571_v9 = vmul.f32 %v4449_v8, %v3555_v50  ;;  %v5180_v11 = vadd.f32 %v3909_v1, %v3578_v7 }
0x1d00   :  { %v3579_v12 = vmul.f32 %v3908_v5, %v3571_v9  ;;  %4310 = vmatprep.mubr.msk.f32.mxu1 %vm91_vm0, %v5180_v11 }
0x1d02   :  { %v5184_v13 = vadd.f32 %v3909_v1, %v3579_v12 }
0x1d04   :  { %4311 = vmatmul.mubr.msk.f32.vlgmr.msra.gmra.mxu1 %vm91_vm0, %v5184_v13 }
0x1dc4   :  { %v4312_v27 = vpop.f32.mrf.mxu1 }
0x1dc5   :  { %v3672_v28 = vadd.f32 %v4312_v27, %v3910_v26 }
0x1dc6   :  { %v3666_v29 = vpop.f32.mrf.mxu1 }
0x1dc7   :  { %v3678_v30 = vmul.f32 0.044715, %v3672_v28  ;;  %v3667_v32 = vadd.f32 %v3910_v26, %v3666_v29  ;;  %v3676_v50 = vmul.f32 0.5, %v3672_v28 }
0x1dc9   :  { %v3680_v35 = vmul.f32 %v3678_v30, %v3672_v28  ;;  %v3677_v38 = vmul.f32 0.044715, %v3667_v32  ;;  %v3675_v48 = vmul.f32 0.5, %v3667_v32 }
0x1dcb   :  { %v3682_v36 = vmul.f32 %v3680_v35, %v3672_v28  ;;  %v3679_v40 = vmul.f32 %v3677_v38, %v3667_v32 }
0x1dcd   :  { %v3684_v42 = vadd.f32 %v3682_v36, %v3672_v28  ;;  %v3681_v37 = vmul.f32 %v3679_v40, %v3667_v32 }
0x1dcf   :  { %v3683_v43 = vadd.f32 %v3681_v37, %v3667_v32  ;;  %v3686_v44 = vmul.f32 0.7978846, %v3684_v42 }
0x1dd1   :  { %v3685_v41 = vmul.f32 0.7978846, %v3683_v43  ;;  %4450 = vtanh.f32 %v3686_v44 }
0x1dd3   :  { %4452 = vtanh.f32 %v3685_v41 }
0x1dde   :  { %v4451_v45 = vpop.eup %4450 }
0x1ddf   :  { %v3690_v47 = vadd.f32 1.0, %v4451_v45 }
0x1de0   :  { %v4453_v46 = vpop.eup %4452 }
0x1de1   :  { %v3689_v49 = vadd.f32 1.0, %v4453_v46  ;;  %v3692_v52 = vmul.f32 %v3690_v47, %v3676_v50 }
0x1de3   :  { %v3691_v51 = vmul.f32 %v3689_v49, %v3675_v48 }
0x1de5   :  { %4345 = vmatprep.mubr.f32.mxu0 %v3691_v51 }
0x1de6   :  { %4346 = vmatmul.mubr.f32.vlgmr.msra.gmra.mxu0 %v3692_v52 }
0x1ea6   :  { %v4347_v53 = vpop.f32.mrf.mxu0 }
0x1ea7   :  { %v3771_v54 = vadd.f32 %v4347_v53, %v3913_v39 }
0x1ea8   :  { %v3765_v55 = vpop.f32.mrf.mxu0 }
0x1ea9   :  { %v3775_v56 = vadd.f32 %v3771_v54, %v5184_v13  ;;  %v3766_v57 = vadd.f32 %v3913_v39, %v3765_v55 }
0x1eab   :  { %v3774_v58 = vadd.f32 %v3766_v57, %v5180_v11  ;;  %v3779_v59 = vsel %vm91_vm0, %v3775_v56, 0.0 }
0x1eac   :  { %3780 = vadd.xlane.f32.xlu1 %v3779_v59 }
0x1ead   :  { %v3776_v34 = vsel %vm91_vm0, %v3774_v58, 0.0 }
0x1eae   :  { %3777 = vadd.xlane.f32.xlu0 %v3776_v34 }
0x1f35   :  { %v3781_v60 = vpop.xlane.xlu1 %3780 }
0x1f36   :  { %v3783_v63 = vmul.f32 0.03125, %v3781_v60 }
0x1f37   :  { %v3778_v0 = vpop.xlane.xlu0 %3777 }
0x1f38   :  { %v3785_v2 = vsub.f32 %v3775_v56, %v3783_v63  ;;  %v3782_v4 = vmul.f32 0.03125, %v3778_v0 }
0x1f3a   :  { %v3784_v5 = vsub.f32 %v3774_v58, %v3782_v4  ;;  %v3787_v6 = vmul.f32 %v3785_v2, %v3785_v2 }
0x1f3c   :  { %v3791_v1 = vsel %vm91_vm0, %v3787_v6, 0.0  ;;  %v3786_v7 = vmul.f32 %v3784_v5, %v3784_v5 }
0x1f3d   :  { %3792 = vadd.xlane.f32.xlu1 %v3791_v1 }
0x1f3e   :  { %v3788_v8 = vsel %vm91_vm0, %v3786_v7, 0.0 }
0x1f3f   :  { %3789 = vadd.xlane.f32.xlu0 %v3788_v8 }
0x1fc6   :  { %v3793_v9 = vpop.xlane.xlu1 %3792 }
0x1fc7   :  { %v3795_v11 = vmul.f32 0.03125, %v3793_v9 }
0x1fc8   :  { %v3790_v12 = vpop.xlane.xlu0 %3789 }
0x1fc9   :  { %v3797_v13 = vadd.f32 1e-12, %v3795_v11  ;;  %v3794_v14 = vmul.f32 0.03125, %v3790_v12 }
0x1fcb   :  { %4454 = vrsqrt.f32 %v3797_v13  ;;  %v3796_v15 = vadd.f32 1e-12, %v3794_v14 }
0x1fcd   :  { %4456 = vrsqrt.f32 %v3796_v15 }
0x1fd8   :  { %v4455_v10 = vpop.eup %4454 }
0x1fd9   :  { %v3801_v16 = vmul.f32 %v4455_v10, %v3785_v2 }
0x1fda   :  { %v4457_v17 = vpop.eup %4456 }
0x1fdb   :  { %v3800_v19 = vmul.f32 %v4457_v17, %v3784_v5  ;;  %v3809_v20 = vmul.f32 %v3914_v3, %v3801_v16 }
0x1fdd   :  { %v3808_v21 = vmul.f32 %v3914_v3, %v3800_v19  ;;  %v3817_v22 = vadd.f32 %v3915_v18, %v3809_v20 }
0x1fdf   :  { %v3816_v23 = vadd.f32 %v3915_v18, %v3808_v21  ;;  %v3819_v24 = vadd.f32 %v3817_v22, %v4972_v62 }
0x1fe1   :  { %v3818_v25 = vadd.f32 %v3816_v23, %v4970_v61  ;;  %3821 = vst.msk [vmem:[#allocation2 + $0x8] sm:$0xff] %vm91_vm0, %v3819_v24 }
0x1fe3   :  { %3820 = vst.msk [vmem:[#allocation2] sm:$0xff] %vm91_vm0, %v3818_v25 }
0x1fe4   :  { %4469 = shalt.err (!%p4466_p4)
}
0x1fe5   :  { %s4497_s26 = smov 128  }
0x1fe6   :  { %3833 = dma.vmem_to_hbm [thread:$0]  %s3828_s13, 256, %s5289_s27, [#allocation3], %s4497_s26, %s4497_s26, %s5340_s6  }
0x1fe7   :  { %4478 = dma.done.wait [#allocation3], 256  }
0x1fe8   :  { %4479 = vsyncadd [#allocation3], 4294967040 }
0x1fe9   :  { %3837 = vsyncpa [#allocation3], 1 }

</bundles_post_ra>
